<compile_context>
chip_gen: v7x
topology: tpu7x:2x2x1
jax: 0.10.0
libtpu: 0.0.40
codegen_flags: <defaults>
</compile_context>

<pallas_src>
import functools
import math

import jax
import jax.numpy as jnp
from jax.experimental import pallas as pl
from jax.experimental.pallas import tpu as pltpu

_LANE_PAD = 128                 # lane-dense width for the final logits store
_MXU_DTYPE = jnp.bfloat16       # matmul operand dtype (f32 accumulation)
_NEG_BIG = -1e30                # additive key-padding mask value


# ---------------------------------------------------------------------------
# In-kernel math helpers (pure jnp, traced inside the Pallas kernel)
# ---------------------------------------------------------------------------
def _layer_norm(x, g, b, eps=1e-12):
    mu = jnp.mean(x, axis=-1, keepdims=True)
    var = jnp.mean(jnp.square(x - mu), axis=-1, keepdims=True)
    return (x - mu) * jax.lax.rsqrt(var + eps) * g + b


def _gelu_exact(x):
    # DistilBERT uses exact (erf-based) GELU.
    return 0.5 * x * (1.0 + jax.lax.erf(x * 0.7071067811865475))


# ---------------------------------------------------------------------------
# Fused per-(batch, layer) kernel.  grid = (B, L):
#   b axis "parallel" (v7x dual TC), l axis "arbitrary" (hidden state carried in scratch).
# ---------------------------------------------------------------------------
def _distilbert_layer_kernel(
    emb_ref,            # (S, D)   f32    embedded tokens for batch b (word + pos)
    bias_ref,           # (1,1,S)  f32    additive key-padding mask (0 / -1e30)
    embg_ref, embb_ref,                   # (1, D) embedding LayerNorm gamma/beta
    wqkvT_ref,          # (3D, D)  bf16   fused QKV weights, (out, in), scale folded into Q
    bqkvT_ref,          # (3D, 1)  f32    fused QKV bias (column), scale folded into Q
    wo_ref, bo_ref,     # (D, D) bf16, (1, D) f32
    ln1g_ref, ln1b_ref,                   # (1, D) f32
    w1_ref, b1_ref,     # (D, F) bf16, (1, F) f32
    w2_ref, b2_ref,     # (F, D) bf16, (1, D) f32
    ln2g_ref, ln2b_ref,                   # (1, D) f32
    prew_ref, preb_ref,                   # (D, D) bf16, (1, D) f32   pre_classifier
    extw_ref, extb_ref,                   # (E, D, D) bf16, (E, 1, D) f32   extra layers
    outw_ref, outb_ref,                   # (D, 128) bf16, (1, 128) f32  lane-padded head
    logits_ref,         # out: (1, 128) f32  (written only at the last layer)
    h_ref,              # scratch: (S, D) f32  hidden state carried across layers
    *, n_heads, n_extra,
):
    f32 = jnp.float32
    bf = _MXU_DTYPE
    l = pl.program_id(1)
    S, D = h_ref.shape
    H = n_heads
    dh = D // H

    # ---- layer 0: load embeddings into the carried scratch and apply embedding LN ----
    @pl.when(l == 0)
    def _():
        h_ref[...] = _layer_norm(emb_ref[...], embg_ref[...], embb_ref[...])

    x = h_ref[...]                                                        # (S, D) f32

    # ---- fused QKV projection, transposed layout: heads land on sublanes --------------
    # (1/sqrt(dh) is folded into the Q rows of wqkvT / bqkvT at pack time.)
    qkvT = jnp.einsum('od,sd->os', wqkvT_ref[...], x.astype(bf),
                      preferred_element_type=f32) + bqkvT_ref[...]        # (3D, S)
    qT = qkvT[0 * D:1 * D].reshape(H, dh, S)                              # (H, dh, S)
    kT = qkvT[1 * D:2 * D].reshape(H, dh, S)                              # (H, dh, S)
    vT = qkvT[2 * D:3 * D].reshape(H, dh, S)                              # (H, dh, S)

    # ---- head-batched attention for this sequence only (no cross-batch score waste) ----
    scores = jnp.einsum('hdq,hdk->hqk', qT.astype(bf), kT.astype(bf),
                        preferred_element_type=f32)                       # (H, S, S)
    scores = scores + bias_ref[...]                                       # additive key mask

    m = jnp.max(scores, axis=-1, keepdims=True)
    e = jnp.exp(scores - m)
    p = e * pl.reciprocal(jnp.sum(e, axis=-1, keepdims=True), approx=True)

    ctxT = jnp.einsum('hdk,hqk->hdq', vT.astype(bf), p.astype(bf),
                      preferred_element_type=f32).reshape(D, S)           # (D, S)
    attn = jnp.einsum('ds,do->so', ctxT.astype(bf), wo_ref[...],
                      preferred_element_type=f32) + bo_ref[...]           # (S, D)
    sa = _layer_norm(attn + x, ln1g_ref[...], ln1b_ref[...])

    # ---- FFN ---------------------------------------------------------------------------
    h1 = _gelu_exact(jnp.dot(sa.astype(bf), w1_ref[...],
                             preferred_element_type=f32) + b1_ref[...])   # (S, F)
    ffn = jnp.dot(h1.astype(bf), w2_ref[...],
                  preferred_element_type=f32) + b2_ref[...]               # (S, D)
    out = _layer_norm(ffn + sa, ln2g_ref[...], ln2b_ref[...])
    h_ref[...] = out

    # ---- last layer: CLS token -> classifier head -> lane-dense logits store ----------
    @pl.when(l == pl.num_programs(1) - 1)
    def _():
        cls = out[0:1, :]                                                 # (1, D) CLS row
        z = jnp.maximum(jnp.dot(cls.astype(bf), prew_ref[...],
                                preferred_element_type=f32) + preb_ref[...], 0.0)
        for j in range(n_extra):                                          # static unroll
            z = jnp.maximum(jnp.dot(z.astype(bf), extw_ref[j],
                                    preferred_element_type=f32) + extb_ref[j], 0.0)
        logits_ref[...] = jnp.dot(z.astype(bf), outw_ref[...],
                                  preferred_element_type=f32) + outb_ref[...]


# ---------------------------------------------------------------------------
# Wrapper: embedding gather in plain JAX, one gridded pallas_call for the encoder + head
# ---------------------------------------------------------------------------
def _vmem_limit_bytes():
    # Generation-aware scoped-VMEM limit (v7x: 64 MiB physical, v5e/v6e: 128 MiB).
    try:
        cap = pltpu.get_tpu_info().vmem_capacity_bytes
    except Exception:
        cap = 64 * 1024 * 1024
    return int(min(cap * 3 // 4, 96 * 1024 * 1024))


def custom_distilbert_forward(packed, input_ids, attention_mask):
    B, S = input_ids.shape
    D = packed['word_emb'].shape[1]
    L = packed['wqkvT'].shape[0]
    F = packed['w1'].shape[2]
    E = packed['extra_w'].shape[0]
    three_d = 3 * D
    num_labels = packed['num_labels']

    # Embedding gather (word + positional) done with a real gather outside the kernel —
    # keeps the vocab table out of VMEM and removes the one-hot MXU work entirely.
    emb = (jnp.take(packed['word_emb'], input_ids.astype(jnp.int32), axis=0)
           + packed['pos_emb'][:S][None, :, :]).astype(jnp.float32)       # (B, S, D)

    # Additive key-padding mask: 0 where valid, -1e30 where padded.  (If a sequence were
    # fully padded the row softmax degenerates to uniform attention, same as masked_fill.)
    bias = jnp.where(attention_mask > 0, 0.0, _NEG_BIG).astype(jnp.float32)
    bias = bias.reshape(B, 1, 1, S)

    kern = functools.partial(_distilbert_layer_kernel,
                             n_heads=packed['n_heads'], n_extra=packed['n_extra'])

    in_specs = [
        pl.BlockSpec((None, S, D), lambda b, l: (b, 0, 0)),        # emb (per batch)
        pl.BlockSpec((None, 1, 1, S), lambda b, l: (b, 0, 0, 0)),  # additive mask
        pl.BlockSpec((1, D), lambda b, l: (0, 0)),                 # emb LN gamma
        pl.BlockSpec((1, D), lambda b, l: (0, 0)),                 # emb LN beta
        pl.BlockSpec((None, three_d, D), lambda b, l: (l, 0, 0)),  # wqkvT  (streamed)
        pl.BlockSpec((None, three_d, 1), lambda b, l: (l, 0, 0)),  # bqkvT
        pl.BlockSpec((None, D, D), lambda b, l: (l, 0, 0)),        # wo
        pl.BlockSpec((None, 1, D), lambda b, l: (l, 0, 0)),        # bo
        pl.BlockSpec((None, 1, D), lambda b, l: (l, 0, 0)),        # ln1 gamma
        pl.BlockSpec((None, 1, D), lambda b, l: (l, 0, 0)),        # ln1 beta
        pl.BlockSpec((None, D, F), lambda b, l: (l, 0, 0)),        # w1
        pl.BlockSpec((None, 1, F), lambda b, l: (l, 0, 0)),        # b1
        pl.BlockSpec((None, F, D), lambda b, l: (l, 0, 0)),        # w2
        pl.BlockSpec((None, 1, D), lambda b, l: (l, 0, 0)),        # b2
        pl.BlockSpec((None, 1, D), lambda b, l: (l, 0, 0)),        # ln2 gamma
        pl.BlockSpec((None, 1, D), lambda b, l: (l, 0, 0)),        # ln2 beta
        pl.BlockSpec((D, D), lambda b, l: (0, 0)),                 # pre_classifier W
        pl.BlockSpec((1, D), lambda b, l: (0, 0)),                 # pre_classifier b
        pl.BlockSpec((E, D, D), lambda b, l: (0, 0, 0)),           # extra layer Ws
        pl.BlockSpec((E, 1, D), lambda b, l: (0, 0, 0)),           # extra layer bs
        pl.BlockSpec((D, _LANE_PAD), lambda b, l: (0, 0)),         # classifier W (padded)
        pl.BlockSpec((1, _LANE_PAD), lambda b, l: (0, 0)),         # classifier b (padded)
    ]
    out_spec = pl.BlockSpec((None, 1, _LANE_PAD), lambda b, l: (b, 0, 0))

    logits_pad = pl.pallas_call(
        kern,
        out_shape=jax.ShapeDtypeStruct((B, 1, _LANE_PAD), jnp.float32),
        grid_spec=pltpu.PrefetchScalarGridSpec(
            num_scalar_prefetch=0,
            grid=(B, L),
            in_specs=in_specs,
            out_specs=out_spec,
            scratch_shapes=[pltpu.VMEM((S, D), jnp.float32)]),
        compiler_params=pltpu.CompilerParams(
            dimension_semantics=("parallel", "arbitrary"),
            vmem_limit_bytes=_vmem_limit_bytes()),
    )(emb, bias,
      packed['emb_ln_g'], packed['emb_ln_b'],
      packed['wqkvT'], packed['bqkvT'], packed['wo'], packed['bo'],
      packed['ln1_g'], packed['ln1_b'],
      packed['w1'], packed['b1'], packed['w2'], packed['b2'],
      packed['ln2_g'], packed['ln2_b'],
      packed['pre_w'], packed['pre_b'], packed['extra_w'], packed['extra_b'],
      packed['out_w_pad'], packed['out_b_pad'])

    return logits_pad[:, 0, :num_labels]


# ---------------------------------------------------------------------------
# Deterministic synthetic parameter init (PyTorch-like layout) + packing for the kernel
# ---------------------------------------------------------------------------
def init_params(key, *, vocab, max_pos, dim, n_heads, ffn, n_layers,
                num_labels, extra_layers):
    def dense(k, fan_in, fan_out):
        kw, kb = jax.random.split(k)
        w = jax.random.normal(kw, (fan_in, fan_out), jnp.float32) * 0.02
        b = jax.random.normal(kb, (1, fan_out), jnp.float32) * 0.02
        return w, b

    keys = jax.random.split(key, 3 + n_layers)
    params = {
        'n_heads': n_heads,
        'word_emb': jax.random.normal(keys[0], (vocab, dim), jnp.float32) * 0.02,
        'pos_emb': jax.random.normal(keys[1], (max_pos, dim), jnp.float32) * 0.02,
        'emb_ln_g': jnp.ones((1, dim), jnp.float32),
        'emb_ln_b': jnp.zeros((1, dim), jnp.float32),
    }
    layers = []
    for i in range(n_layers):
        lk = jax.random.split(keys[2 + i], 6)
        wq, bq = dense(lk[0], dim, dim)
        wk, bk = dense(lk[1], dim, dim)
        wv, bv = dense(lk[2], dim, dim)
        wo, bo = dense(lk[3], dim, dim)
        w1, b1 = dense(lk[4], dim, ffn)
        w2, b2 = dense(lk[5], ffn, dim)
        layers.append(dict(
            wq=wq, bq=bq, wk=wk, bk=bk, wv=wv, bv=bv, wo=wo, bo=bo,
            ln1_g=jnp.ones((1, dim), jnp.float32), ln1_b=jnp.zeros((1, dim), jnp.float32),
            w1=w1, b1=b1, w2=w2, b2=b2,
            ln2_g=jnp.ones((1, dim), jnp.float32), ln2_b=jnp.zeros((1, dim), jnp.float32),
        ))
    params['layers'] = layers

    ck = jax.random.split(keys[2 + n_layers], 2 + extra_layers)
    pre_w, pre_b = dense(ck[0], dim, dim)
    extra = [dense(ck[1 + j], dim, dim) for j in range(extra_layers)]
    out_w, out_b = dense(ck[1 + extra_layers], dim, num_labels)
    params['cls'] = dict(pre_w=pre_w, pre_b=pre_b, extra=extra,
                         out_w=out_w, out_b=out_b)
    params['num_labels'] = num_labels
    return params


def pack_params(params):
    """Stack per-layer weights on a leading L axis (for BlockSpec streaming), store matmul
    weights as bf16, fold the 1/sqrt(dh) attention scale into the Q block of QKV."""
    layers = params['layers']
    D = params['word_emb'].shape[1]
    H = params['n_heads']
    scale = 1.0 / math.sqrt(D // H)
    num_labels = params['num_labels']
    bf = _MXU_DTYPE

    def stack(name):
        return jnp.stack([lp[name] for lp in layers], axis=0)

    # fused QKV in (out, in) layout; attention scale folded into Q weights and bias.
    wqkvT = jnp.stack(
        [jnp.concatenate([(lp['wq'] * scale).T, lp['wk'].T, lp['wv'].T], axis=0)
         for lp in layers], axis=0).astype(bf)                              # (L, 3D, D)
    bqkvT = jnp.stack(
        [jnp.concatenate([lp['bq'] * scale, lp['bk'], lp['bv']], axis=1).reshape(3 * D, 1)
         for lp in layers], axis=0).astype(jnp.float32)                     # (L, 3D, 1)

    cls = params['cls']
    n_extra = len(cls['extra'])
    if n_extra:
        extra_w = jnp.stack([w for (w, _) in cls['extra']], axis=0).astype(bf)  # (E, D, D)
        extra_b = jnp.stack([b for (_, b) in cls['extra']], axis=0)             # (E, 1, D)
    else:  # dummy (unused) buffers keep the kernel signature stable
        extra_w = jnp.zeros((1, D, D), bf)
        extra_b = jnp.zeros((1, 1, D), jnp.float32)

    out_w_pad = jnp.zeros((D, _LANE_PAD), jnp.float32).at[:, :num_labels].set(cls['out_w'])
    out_b_pad = jnp.zeros((1, _LANE_PAD), jnp.float32).at[:, :num_labels].set(cls['out_b'])

    return dict(
        n_heads=H, n_extra=n_extra, num_labels=num_labels,
        word_emb=params['word_emb'], pos_emb=params['pos_emb'],
        emb_ln_g=params['emb_ln_g'], emb_ln_b=params['emb_ln_b'],
        wqkvT=wqkvT, bqkvT=bqkvT,
        wo=stack('wo').astype(bf), bo=stack('bo'),
        ln1_g=stack('ln1_g'), ln1_b=stack('ln1_b'),
        w1=stack('w1').astype(bf), b1=stack('b1'),
        w2=stack('w2').astype(bf), b2=stack('b2'),
        ln2_g=stack('ln2_g'), ln2_b=stack('ln2_b'),
        pre_w=cls['pre_w'].astype(bf), pre_b=cls['pre_b'],
        extra_w=extra_w, extra_b=extra_b,
        out_w_pad=out_w_pad.astype(bf), out_b_pad=out_b_pad,
    )


if __name__ == "__main__":
    key = jax.random.PRNGKey(0)
    k_params, k_ids = jax.random.split(key)

    B, S = 2, 8
    cfg = dict(vocab=50, max_pos=32, dim=32, n_heads=4, ffn=64,
               n_layers=2, num_labels=3, extra_layers=1)

    params = init_params(k_params, **cfg)
    packed = pack_params(params)

    input_ids = jax.random.randint(k_ids, (B, S), 0, cfg['vocab'], dtype=jnp.int32)
    attention_mask = jnp.ones((B, S), jnp.int32).at[1, -2:].set(0)  # padding on row 1

    logits = custom_distilbert_forward(packed, input_ids, attention_mask)
    jax.block_until_ready(logits)
    assert logits.shape == (B, cfg['num_labels'])
    print("KERNEL_OK")
</pallas_src>

<mosaic_0001>
module attributes {stable_mosaic.version = 11 : i64} {
  func.func @_distilbert_layer_kernel(%arg0: i32, %arg1: i32, %arg2: memref<1x8x32xf32, #tpu.memory_space<vmem>>, %arg3: memref<1x1x1x8xf32, #tpu.memory_space<vmem>>, %arg4: memref<1x32xf32, #tpu.memory_space<vmem>>, %arg5: memref<1x32xf32, #tpu.memory_space<vmem>>, %arg6: memref<1x96x32xbf16, #tpu.memory_space<vmem>>, %arg7: memref<1x96x1xf32, #tpu.memory_space<vmem>>, %arg8: memref<1x32x32xbf16, #tpu.memory_space<vmem>>, %arg9: memref<1x1x32xf32, #tpu.memory_space<vmem>>, %arg10: memref<1x1x32xf32, #tpu.memory_space<vmem>>, %arg11: memref<1x1x32xf32, #tpu.memory_space<vmem>>, %arg12: memref<1x32x64xbf16, #tpu.memory_space<vmem>>, %arg13: memref<1x1x64xf32, #tpu.memory_space<vmem>>, %arg14: memref<1x64x32xbf16, #tpu.memory_space<vmem>>, %arg15: memref<1x1x32xf32, #tpu.memory_space<vmem>>, %arg16: memref<1x1x32xf32, #tpu.memory_space<vmem>>, %arg17: memref<1x1x32xf32, #tpu.memory_space<vmem>>, %arg18: memref<32x32xbf16, #tpu.memory_space<vmem>>, %arg19: memref<1x32xf32, #tpu.memory_space<vmem>>, %arg20: memref<1x32x32xbf16, #tpu.memory_space<vmem>>, %arg21: memref<1x1x32xf32, #tpu.memory_space<vmem>>, %arg22: memref<32x128xbf16, #tpu.memory_space<vmem>>, %arg23: memref<1x128xf32, #tpu.memory_space<vmem>>, %arg24: memref<1x1x128xf32, #tpu.memory_space<vmem>>, %arg25: memref<8x32xf32, #tpu.memory_space<vmem>>) attributes {dimension_semantics = [#tpu.dimension_semantics<parallel>, #tpu.dimension_semantics<arbitrary>], iteration_bounds = array<i64: 2, 2>, scalar_prefetch = 0 : i64, scratch_operands = 1 : i64, tpu.core_type = #tpu.core_type<tc>, window_params = [{transform_indices = @transform_0, window_bounds = array<i64: 1, 8, 32>}, {transform_indices = @transform_1, window_bounds = array<i64: 1, 1, 1, 8>}, {pipeline_mode = #tpu.pipeline_mode<synchronous>, transform_indices = @transform_2, window_bounds = array<i64: 1, 32>}, {pipeline_mode = #tpu.pipeline_mode<synchronous>, transform_indices = @transform_3, window_bounds = array<i64: 1, 32>}, {transform_indices = @transform_4, window_bounds = array<i64: 1, 96, 32>}, {transform_indices = @transform_5, window_bounds = array<i64: 1, 96, 1>}, {transform_indices = @transform_6, window_bounds = array<i64: 1, 32, 32>}, {transform_indices = @transform_7, window_bounds = array<i64: 1, 1, 32>}, {transform_indices = @transform_8, window_bounds = array<i64: 1, 1, 32>}, {transform_indices = @transform_9, window_bounds = array<i64: 1, 1, 32>}, {transform_indices = @transform_10, window_bounds = array<i64: 1, 32, 64>}, {transform_indices = @transform_11, window_bounds = array<i64: 1, 1, 64>}, {transform_indices = @transform_12, window_bounds = array<i64: 1, 64, 32>}, {transform_indices = @transform_13, window_bounds = array<i64: 1, 1, 32>}, {transform_indices = @transform_14, window_bounds = array<i64: 1, 1, 32>}, {transform_indices = @transform_15, window_bounds = array<i64: 1, 1, 32>}, {pipeline_mode = #tpu.pipeline_mode<synchronous>, transform_indices = @transform_16, window_bounds = array<i64: 32, 32>}, {pipeline_mode = #tpu.pipeline_mode<synchronous>, transform_indices = @transform_17, window_bounds = array<i64: 1, 32>}, {pipeline_mode = #tpu.pipeline_mode<synchronous>, transform_indices = @transform_18, window_bounds = array<i64: 1, 32, 32>}, {pipeline_mode = #tpu.pipeline_mode<synchronous>, transform_indices = @transform_19, window_bounds = array<i64: 1, 1, 32>}, {pipeline_mode = #tpu.pipeline_mode<synchronous>, transform_indices = @transform_20, window_bounds = array<i64: 32, 128>}, {pipeline_mode = #tpu.pipeline_mode<synchronous>, transform_indices = @transform_21, window_bounds = array<i64: 1, 128>}, {transform_indices = @transform_22, window_bounds = array<i64: 1, 1, 128>}]} {
    %c0_i32 = arith.constant 0 : i32
    %0 = arith.cmpi eq, %arg1, %c0_i32 : i32
    %1 = arith.extui %0 : i1 to i32
    %c0_i32_0 = arith.constant 0 : i32
    %2 = arith.cmpi ne, %1, %c0_i32_0 : i32
    scf.if %2 {
      %c0_65 = arith.constant 0 : index
      %c0_66 = arith.constant 0 : index
      %c0_67 = arith.constant 0 : index
      %129 = vector.load %arg2[%c0_65, %c0_66, %c0_67] : memref<1x8x32xf32, #tpu.memory_space<vmem>>, vector<1x8x32xf32>
      %130 = vector.shape_cast %129 : vector<1x8x32xf32> to vector<8x32xf32>
      %c0_68 = arith.constant 0 : index
      %c0_69 = arith.constant 0 : index
      %131 = vector.load %arg4[%c0_68, %c0_69] : memref<1x32xf32, #tpu.memory_space<vmem>>, vector<1x32xf32>
      %c0_70 = arith.constant 0 : index
      %c0_71 = arith.constant 0 : index
      %132 = vector.load %arg5[%c0_70, %c0_71] : memref<1x32xf32, #tpu.memory_space<vmem>>, vector<1x32xf32>
      %cst_72 = arith.constant dense<0.000000e+00> : vector<8xf32>
      %133 = vector.multi_reduction <add>, %130, %cst_72 [1] : vector<8x32xf32> to vector<8xf32>
      %134 = vector.shape_cast %133 : vector<8xf32> to vector<8x1xf32>
      %cst_73 = arith.constant 3.200000e+01 : f32
      %135 = vector.broadcast %cst_73 : f32 to vector<8x1xf32>
      %136 = arith.divf %134, %135 : vector<8x1xf32>
      %137 = vector.broadcast %136 : vector<8x1xf32> to vector<8x32xf32>
      %138 = arith.subf %130, %137 : vector<8x32xf32>
      %139 = arith.mulf %138, %138 : vector<8x32xf32>
      %cst_74 = arith.constant dense<0.000000e+00> : vector<8xf32>
      %140 = vector.multi_reduction <add>, %139, %cst_74 [1] : vector<8x32xf32> to vector<8xf32>
      %141 = vector.shape_cast %140 : vector<8xf32> to vector<8x1xf32>
      %cst_75 = arith.constant 3.200000e+01 : f32
      %142 = vector.broadcast %cst_75 : f32 to vector<8x1xf32>
      %143 = arith.divf %141, %142 : vector<8x1xf32>
      %144 = vector.broadcast %136 : vector<8x1xf32> to vector<8x32xf32>
      %145 = arith.subf %130, %144 : vector<8x32xf32>
      %cst_76 = arith.constant 9.99999996E-13 : f32
      %146 = vector.broadcast %cst_76 : f32 to vector<8x1xf32>
      %147 = arith.addf %143, %146 : vector<8x1xf32>
      %148 = math.rsqrt %147 : vector<8x1xf32>
      %149 = vector.broadcast %148 : vector<8x1xf32> to vector<8x32xf32>
      %150 = arith.mulf %145, %149 : vector<8x32xf32>
      %151 = vector.broadcast %131 : vector<1x32xf32> to vector<8x32xf32>
      %152 = arith.mulf %150, %151 : vector<8x32xf32>
      %153 = vector.broadcast %132 : vector<1x32xf32> to vector<8x32xf32>
      %154 = arith.addf %152, %153 : vector<8x32xf32>
      %c0_77 = arith.constant 0 : index
      %c0_78 = arith.constant 0 : index
      %155 = vector.load %arg25[%c0_77, %c0_78] : memref<8x32xf32, #tpu.memory_space<vmem>>, vector<8x32xf32>
      tpu.vector_store %arg25[%c0_77, %c0_78], %154 {strides = array<i32>} : memref<8x32xf32, #tpu.memory_space<vmem>>, vector<8x32xf32>,
    } else {
    }
    %c0 = arith.constant 0 : index
    %c0_1 = arith.constant 0 : index
    %3 = vector.load %arg25[%c0, %c0_1] : memref<8x32xf32, #tpu.memory_space<vmem>>, vector<8x32xf32>
    %c0_2 = arith.constant 0 : index
    %c0_3 = arith.constant 0 : index
    %c0_4 = arith.constant 0 : index
    %4 = vector.load %arg6[%c0_2, %c0_3, %c0_4] : memref<1x96x32xbf16, #tpu.memory_space<vmem>>, vector<1x96x32xbf16>
    %5 = vector.shape_cast %4 : vector<1x96x32xbf16> to vector<96x32xbf16>
    %6 = arith.truncf %3 : vector<8x32xf32> to vector<8x32xbf16>
    "tpu.trace_start"() <{level = 10 : i32, message = "od,sd->os"}> : () -> ()
    %cst = arith.constant dense<0.000000e+00> : vector<96x8xf32>
    %7 = tpu.matmul %5, %6, %cst {dimension_numbers = #tpu.dot_dimension_numbers<[1], [1], [0], [0], [0, 0, 1, 0], [], []>} : vector<96x32xbf16>, vector<8x32xbf16>, vector<96x8xf32> -> vector<96x8xf32>
    "tpu.trace_stop"() : () -> ()
    %c0_5 = arith.constant 0 : index
    %c0_6 = arith.constant 0 : index
    %c0_7 = arith.constant 0 : index
    %8 = vector.load %arg7[%c0_5, %c0_6, %c0_7] : memref<1x96x1xf32, #tpu.memory_space<vmem>>, vector<1x96x1xf32>
    %9 = vector.shape_cast %8 : vector<1x96x1xf32> to vector<96x1xf32>
    %10 = vector.broadcast %9 : vector<96x1xf32> to vector<96x8xf32>
    %11 = arith.addf %7, %10 : vector<96x8xf32>
    %12 = vector.extract_strided_slice %11 {offsets = [0, 0], sizes = [32, 8], strides = [1, 1]} : vector<96x8xf32> to vector<32x8xf32>
    %13 = vector.shape_cast %12 : vector<32x8xf32> to vector<4x8x8xf32>
    %14 = vector.extract_strided_slice %11 {offsets = [32, 0], sizes = [32, 8], strides = [1, 1]} : vector<96x8xf32> to vector<32x8xf32>
    %15 = vector.shape_cast %14 : vector<32x8xf32> to vector<4x8x8xf32>
    %16 = vector.extract_strided_slice %11 {offsets = [64, 0], sizes = [32, 8], strides = [1, 1]} : vector<96x8xf32> to vector<32x8xf32>
    %17 = vector.shape_cast %16 : vector<32x8xf32> to vector<4x8x8xf32>
    %18 = arith.truncf %13 : vector<4x8x8xf32> to vector<4x8x8xbf16>
    %19 = arith.truncf %15 : vector<4x8x8xf32> to vector<4x8x8xbf16>
    "tpu.trace_start"() <{level = 10 : i32, message = "hdq,hdk->hqk"}> : () -> ()
    %cst_8 = arith.constant dense<0.000000e+00> : vector<4x8x8xf32>
    %20 = tpu.matmul %18, %19, %cst_8 {dimension_numbers = #tpu.dot_dimension_numbers<[1], [1], [2], [2], [0, 0, 0, 2, 1, 2], [0], [0]>} : vector<4x8x8xbf16>, vector<4x8x8xbf16>, vector<4x8x8xf32> -> vector<4x8x8xf32>
    "tpu.trace_stop"() : () -> ()
    %c0_9 = arith.constant 0 : index
    %c0_10 = arith.constant 0 : index
    %c0_11 = arith.constant 0 : index
    %c0_12 = arith.constant 0 : index
    %21 = vector.load %arg3[%c0_9, %c0_10, %c0_11, %c0_12] : memref<1x1x1x8xf32, #tpu.memory_space<vmem>>, vector<1x1x1x8xf32>
    %22 = vector.shape_cast %21 : vector<1x1x1x8xf32> to vector<1x1x8xf32>
    %23 = vector.broadcast %22 : vector<1x1x8xf32> to vector<4x8x8xf32>
    %24 = arith.addf %20, %23 : vector<4x8x8xf32>
    %cst_13 = arith.constant dense<0xFF800000> : vector<4x8xf32>
    %25 = vector.multi_reduction <maximumf>, %24, %cst_13 [2] : vector<4x8x8xf32> to vector<4x8xf32>
    %26 = vector.shape_cast %25 : vector<4x8xf32> to vector<4x8x1xf32>
    %27 = vector.broadcast %26 : vector<4x8x1xf32> to vector<4x8x8xf32>
    %28 = arith.subf %24, %27 : vector<4x8x8xf32>
    %29 = math.exp %28 : vector<4x8x8xf32>
    %cst_14 = arith.constant dense<0.000000e+00> : vector<4x8xf32>
    %30 = vector.multi_reduction <add>, %29, %cst_14 [2] : vector<4x8x8xf32> to vector<4x8xf32>
    %31 = vector.shape_cast %30 : vector<4x8xf32> to vector<4x8x1xf32>
    %32 = tpu.reciprocal %31 {approx = true} : vector<4x8x1xf32> -> vector<4x8x1xf32>
    %33 = vector.broadcast %32 : vector<4x8x1xf32> to vector<4x8x8xf32>
    %34 = arith.mulf %29, %33 : vector<4x8x8xf32>
    %35 = arith.truncf %17 : vector<4x8x8xf32> to vector<4x8x8xbf16>
    %36 = arith.truncf %34 : vector<4x8x8xf32> to vector<4x8x8xbf16>
    "tpu.trace_start"() <{level = 10 : i32, message = "hdk,hqk->hdq"}> : () -> ()
    %cst_15 = arith.constant dense<0.000000e+00> : vector<4x8x8xf32>
    %37 = tpu.matmul %35, %36, %cst_15 {dimension_numbers = #tpu.dot_dimension_numbers<[2], [2], [1], [1], [0, 0, 0, 1, 1, 1], [0], [0]>} : vector<4x8x8xbf16>, vector<4x8x8xbf16>, vector<4x8x8xf32> -> vector<4x8x8xf32>
    "tpu.trace_stop"() : () -> ()
    %38 = vector.shape_cast %37 : vector<4x8x8xf32> to vector<32x8xf32>
    %39 = arith.truncf %38 : vector<32x8xf32> to vector<32x8xbf16>
    %c0_16 = arith.constant 0 : index
    %c0_17 = arith.constant 0 : index
    %c0_18 = arith.constant 0 : index
    %40 = vector.load %arg8[%c0_16, %c0_17, %c0_18] : memref<1x32x32xbf16, #tpu.memory_space<vmem>>, vector<1x32x32xbf16>
    %41 = vector.shape_cast %40 : vector<1x32x32xbf16> to vector<32x32xbf16>
    "tpu.trace_start"() <{level = 10 : i32, message = "ds,do->so"}> : () -> ()
    %cst_19 = arith.constant dense<0.000000e+00> : vector<8x32xf32>
    %42 = tpu.matmul %39, %41, %cst_19 {dimension_numbers = #tpu.dot_dimension_numbers<[0], [0], [1], [1], [0, 1, 1, 1], [], []>} : vector<32x8xbf16>, vector<32x32xbf16>, vector<8x32xf32> -> vector<8x32xf32>
    "tpu.trace_stop"() : () -> ()
    %c0_20 = arith.constant 0 : index
    %c0_21 = arith.constant 0 : index
    %c0_22 = arith.constant 0 : index
    %43 = vector.load %arg9[%c0_20, %c0_21, %c0_22] : memref<1x1x32xf32, #tpu.memory_space<vmem>>, vector<1x1x32xf32>
    %44 = vector.shape_cast %43 : vector<1x1x32xf32> to vector<1x32xf32>
    %45 = vector.broadcast %44 : vector<1x32xf32> to vector<8x32xf32>
    %46 = arith.addf %42, %45 : vector<8x32xf32>
    %47 = arith.addf %46, %3 : vector<8x32xf32>
    %c0_23 = arith.constant 0 : index
    %c0_24 = arith.constant 0 : index
    %c0_25 = arith.constant 0 : index
    %48 = vector.load %arg10[%c0_23, %c0_24, %c0_25] : memref<1x1x32xf32, #tpu.memory_space<vmem>>, vector<1x1x32xf32>
    %49 = vector.shape_cast %48 : vector<1x1x32xf32> to vector<1x32xf32>
    %c0_26 = arith.constant 0 : index
    %c0_27 = arith.constant 0 : index
    %c0_28 = arith.constant 0 : index
    %50 = vector.load %arg11[%c0_26, %c0_27, %c0_28] : memref<1x1x32xf32, #tpu.memory_space<vmem>>, vector<1x1x32xf32>
    %51 = vector.shape_cast %50 : vector<1x1x32xf32> to vector<1x32xf32>
    %cst_29 = arith.constant dense<0.000000e+00> : vector<8xf32>
    %52 = vector.multi_reduction <add>, %47, %cst_29 [1] : vector<8x32xf32> to vector<8xf32>
    %53 = vector.shape_cast %52 : vector<8xf32> to vector<8x1xf32>
    %cst_30 = arith.constant 3.200000e+01 : f32
    %54 = vector.broadcast %cst_30 : f32 to vector<8x1xf32>
    %55 = arith.divf %53, %54 : vector<8x1xf32>
    %56 = vector.broadcast %55 : vector<8x1xf32> to vector<8x32xf32>
    %57 = arith.subf %47, %56 : vector<8x32xf32>
    %58 = arith.mulf %57, %57 : vector<8x32xf32>
    %cst_31 = arith.constant dense<0.000000e+00> : vector<8xf32>
    %59 = vector.multi_reduction <add>, %58, %cst_31 [1] : vector<8x32xf32> to vector<8xf32>
    %60 = vector.shape_cast %59 : vector<8xf32> to vector<8x1xf32>
    %cst_32 = arith.constant 3.200000e+01 : f32
    %61 = vector.broadcast %cst_32 : f32 to vector<8x1xf32>
    %62 = arith.divf %60, %61 : vector<8x1xf32>
    %63 = vector.broadcast %55 : vector<8x1xf32> to vector<8x32xf32>
    %64 = arith.subf %47, %63 : vector<8x32xf32>
    %cst_33 = arith.constant 9.99999996E-13 : f32
    %65 = vector.broadcast %cst_33 : f32 to vector<8x1xf32>
    %66 = arith.addf %62, %65 : vector<8x1xf32>
    %67 = math.rsqrt %66 : vector<8x1xf32>
    %68 = vector.broadcast %67 : vector<8x1xf32> to vector<8x32xf32>
    %69 = arith.mulf %64, %68 : vector<8x32xf32>
    %70 = vector.broadcast %49 : vector<1x32xf32> to vector<8x32xf32>
    %71 = arith.mulf %69, %70 : vector<8x32xf32>
    %72 = vector.broadcast %51 : vector<1x32xf32> to vector<8x32xf32>
    %73 = arith.addf %71, %72 : vector<8x32xf32>
    %74 = arith.truncf %73 : vector<8x32xf32> to vector<8x32xbf16>
    %c0_34 = arith.constant 0 : index
    %c0_35 = arith.constant 0 : index
    %c0_36 = arith.constant 0 : index
    %75 = vector.load %arg12[%c0_34, %c0_35, %c0_36] : memref<1x32x64xbf16, #tpu.memory_space<vmem>>, vector<1x32x64xbf16>
    %76 = vector.shape_cast %75 : vector<1x32x64xbf16> to vector<32x64xbf16>
    %cst_37 = arith.constant dense<0.000000e+00> : vector<8x64xf32>
    %77 = tpu.matmul %74, %76, %cst_37 {dimension_numbers = #tpu.dot_dimension_numbers<[1], [0], [0], [1], [0, 0, 1, 1], [], []>} : vector<8x32xbf16>, vector<32x64xbf16>, vector<8x64xf32> -> vector<8x64xf32>
    %c0_38 = arith.constant 0 : index
    %c0_39 = arith.constant 0 : index
    %c0_40 = arith.constant 0 : index
    %78 = vector.load %arg13[%c0_38, %c0_39, %c0_40] : memref<1x1x64xf32, #tpu.memory_space<vmem>>, vector<1x1x64xf32>
    %79 = vector.shape_cast %78 : vector<1x1x64xf32> to vector<1x64xf32>
    %80 = vector.broadcast %79 : vector<1x64xf32> to vector<8x64xf32>
    %81 = arith.addf %77, %80 : vector<8x64xf32>
    %cst_41 = arith.constant 5.000000e-01 : f32
    %82 = vector.broadcast %cst_41 : f32 to vector<8x64xf32>
    %83 = arith.mulf %82, %81 : vector<8x64xf32>
    %cst_42 = arith.constant 0.707106769 : f32
    %84 = vector.broadcast %cst_42 : f32 to vector<8x64xf32>
    %85 = arith.mulf %81, %84 : vector<8x64xf32>
    %86 = math.erf %85 : vector<8x64xf32>
    %cst_43 = arith.constant 1.000000e+00 : f32
    %87 = vector.broadcast %cst_43 : f32 to vector<8x64xf32>
    %88 = arith.addf %87, %86 : vector<8x64xf32>
    %89 = arith.mulf %83, %88 : vector<8x64xf32>
    %90 = arith.truncf %89 : vector<8x64xf32> to vector<8x64xbf16>
    %c0_44 = arith.constant 0 : index
    %c0_45 = arith.constant 0 : index
    %c0_46 = arith.constant 0 : index
    %91 = vector.load %arg14[%c0_44, %c0_45, %c0_46] : memref<1x64x32xbf16, #tpu.memory_space<vmem>>, vector<1x64x32xbf16>
    %92 = vector.shape_cast %91 : vector<1x64x32xbf16> to vector<64x32xbf16>
    %cst_47 = arith.constant dense<0.000000e+00> : vector<8x32xf32>
    %93 = tpu.matmul %90, %92, %cst_47 {dimension_numbers = #tpu.dot_dimension_numbers<[1], [0], [0], [1], [0, 0, 1, 1], [], []>} : vector<8x64xbf16>, vector<64x32xbf16>, vector<8x32xf32> -> vector<8x32xf32>
    %c0_48 = arith.constant 0 : index
    %c0_49 = arith.constant 0 : index
    %c0_50 = arith.constant 0 : index
    %94 = vector.load %arg15[%c0_48, %c0_49, %c0_50] : memref<1x1x32xf32, #tpu.memory_space<vmem>>, vector<1x1x32xf32>
    %95 = vector.shape_cast %94 : vector<1x1x32xf32> to vector<1x32xf32>
    %96 = vector.broadcast %95 : vector<1x32xf32> to vector<8x32xf32>
    %97 = arith.addf %93, %96 : vector<8x32xf32>
    %98 = arith.addf %97, %73 : vector<8x32xf32>
    %c0_51 = arith.constant 0 : index
    %c0_52 = arith.constant 0 : index
    %c0_53 = arith.constant 0 : index
    %99 = vector.load %arg16[%c0_51, %c0_52, %c0_53] : memref<1x1x32xf32, #tpu.memory_space<vmem>>, vector<1x1x32xf32>
    %100 = vector.shape_cast %99 : vector<1x1x32xf32> to vector<1x32xf32>
    %c0_54 = arith.constant 0 : index
    %c0_55 = arith.constant 0 : index
    %c0_56 = arith.constant 0 : index
    %101 = vector.load %arg17[%c0_54, %c0_55, %c0_56] : memref<1x1x32xf32, #tpu.memory_space<vmem>>, vector<1x1x32xf32>
    %102 = vector.shape_cast %101 : vector<1x1x32xf32> to vector<1x32xf32>
    %cst_57 = arith.constant dense<0.000000e+00> : vector<8xf32>
    %103 = vector.multi_reduction <add>, %98, %cst_57 [1] : vector<8x32xf32> to vector<8xf32>
    %104 = vector.shape_cast %103 : vector<8xf32> to vector<8x1xf32>
    %cst_58 = arith.constant 3.200000e+01 : f32
    %105 = vector.broadcast %cst_58 : f32 to vector<8x1xf32>
    %106 = arith.divf %104, %105 : vector<8x1xf32>
    %107 = vector.broadcast %106 : vector<8x1xf32> to vector<8x32xf32>
    %108 = arith.subf %98, %107 : vector<8x32xf32>
    %109 = arith.mulf %108, %108 : vector<8x32xf32>
    %cst_59 = arith.constant dense<0.000000e+00> : vector<8xf32>
    %110 = vector.multi_reduction <add>, %109, %cst_59 [1] : vector<8x32xf32> to vector<8xf32>
    %111 = vector.shape_cast %110 : vector<8xf32> to vector<8x1xf32>
    %cst_60 = arith.constant 3.200000e+01 : f32
    %112 = vector.broadcast %cst_60 : f32 to vector<8x1xf32>
    %113 = arith.divf %111, %112 : vector<8x1xf32>
    %114 = vector.broadcast %106 : vector<8x1xf32> to vector<8x32xf32>
    %115 = arith.subf %98, %114 : vector<8x32xf32>
    %cst_61 = arith.constant 9.99999996E-13 : f32
    %116 = vector.broadcast %cst_61 : f32 to vector<8x1xf32>
    %117 = arith.addf %113, %116 : vector<8x1xf32>
    %118 = math.rsqrt %117 : vector<8x1xf32>
    %119 = vector.broadcast %118 : vector<8x1xf32> to vector<8x32xf32>
    %120 = arith.mulf %115, %119 : vector<8x32xf32>
    %121 = vector.broadcast %100 : vector<1x32xf32> to vector<8x32xf32>
    %122 = arith.mulf %120, %121 : vector<8x32xf32>
    %123 = vector.broadcast %102 : vector<1x32xf32> to vector<8x32xf32>
    %124 = arith.addf %122, %123 : vector<8x32xf32>
    %c0_62 = arith.constant 0 : index
    %c0_63 = arith.constant 0 : index
    %125 = vector.load %arg25[%c0_62, %c0_63] : memref<8x32xf32, #tpu.memory_space<vmem>>, vector<8x32xf32>
    tpu.vector_store %arg25[%c0_62, %c0_63], %124 {strides = array<i32>} : memref<8x32xf32, #tpu.memory_space<vmem>>, vector<8x32xf32>,
    %c1_i32 = arith.constant 1 : i32
    %126 = arith.cmpi eq, %arg1, %c1_i32 : i32
    %127 = arith.extui %126 : i1 to i32
    %c0_i32_64 = arith.constant 0 : i32
    %128 = arith.cmpi ne, %127, %c0_i32_64 : i32
    scf.if %128 {
      %129 = vector.extract_strided_slice %124 {offsets = [0, 0], sizes = [1, 32], strides = [1, 1]} : vector<8x32xf32> to vector<1x32xf32>
      %130 = arith.truncf %129 : vector<1x32xf32> to vector<1x32xbf16>
      %c0_65 = arith.constant 0 : index
      %c0_66 = arith.constant 0 : index
      %131 = vector.load %arg18[%c0_65, %c0_66] : memref<32x32xbf16, #tpu.memory_space<vmem>>, vector<32x32xbf16>
      %cst_67 = arith.constant dense<0.000000e+00> : vector<1x32xf32>
      %132 = tpu.matmul %130, %131, %cst_67 {dimension_numbers = #tpu.dot_dimension_numbers<[1], [0], [0], [1], [0, 0, 1, 1], [], []>} : vector<1x32xbf16>, vector<32x32xbf16>, vector<1x32xf32> -> vector<1x32xf32>
      %c0_68 = arith.constant 0 : index
      %c0_69 = arith.constant 0 : index
      %133 = vector.load %arg19[%c0_68, %c0_69] : memref<1x32xf32, #tpu.memory_space<vmem>>, vector<1x32xf32>
      %134 = arith.addf %132, %133 : vector<1x32xf32>
      %cst_70 = arith.constant 0.000000e+00 : f32
      %135 = vector.broadcast %cst_70 : f32 to vector<1x32xf32>
      %136 = arith.maximumf %134, %135 : vector<1x32xf32>
      %137 = arith.truncf %136 : vector<1x32xf32> to vector<1x32xbf16>
      %c0_71 = arith.constant 0 : index
      %c0_72 = arith.constant 0 : index
      %c0_73 = arith.constant 0 : index
      %138 = vector.load %arg20[%c0_71, %c0_72, %c0_73] : memref<1x32x32xbf16, #tpu.memory_space<vmem>>, vector<1x32x32xbf16>
      %139 = vector.shape_cast %138 : vector<1x32x32xbf16> to vector<32x32xbf16>
      %cst_74 = arith.constant dense<0.000000e+00> : vector<1x32xf32>
      %140 = tpu.matmul %137, %139, %cst_74 {dimension_numbers = #tpu.dot_dimension_numbers<[1], [0], [0], [1], [0, 0, 1, 1], [], []>} : vector<1x32xbf16>, vector<32x32xbf16>, vector<1x32xf32> -> vector<1x32xf32>
      %c0_75 = arith.constant 0 : index
      %c0_76 = arith.constant 0 : index
      %c0_77 = arith.constant 0 : index
      %141 = vector.load %arg21[%c0_75, %c0_76, %c0_77] : memref<1x1x32xf32, #tpu.memory_space<vmem>>, vector<1x1x32xf32>
      %142 = vector.shape_cast %141 : vector<1x1x32xf32> to vector<1x32xf32>
      %143 = arith.addf %140, %142 : vector<1x32xf32>
      %cst_78 = arith.constant 0.000000e+00 : f32
      %144 = vector.broadcast %cst_78 : f32 to vector<1x32xf32>
      %145 = arith.maximumf %143, %144 : vector<1x32xf32>
      %146 = arith.truncf %145 : vector<1x32xf32> to vector<1x32xbf16>
      %c0_79 = arith.constant 0 : index
      %c0_80 = arith.constant 0 : index
      %147 = vector.load %arg22[%c0_79, %c0_80] : memref<32x128xbf16, #tpu.memory_space<vmem>>, vector<32x128xbf16>
      %cst_81 = arith.constant dense<0.000000e+00> : vector<1x128xf32>
      %148 = tpu.matmul %146, %147, %cst_81 {dimension_numbers = #tpu.dot_dimension_numbers<[1], [0], [0], [1], [0, 0, 1, 1], [], []>} : vector<1x32xbf16>, vector<32x128xbf16>, vector<1x128xf32> -> vector<1x128xf32>
      %c0_82 = arith.constant 0 : index
      %c0_83 = arith.constant 0 : index
      %149 = vector.load %arg23[%c0_82, %c0_83] : memref<1x128xf32, #tpu.memory_space<vmem>>, vector<1x128xf32>
      %150 = arith.addf %148, %149 : vector<1x128xf32>
      %c0_84 = arith.constant 0 : index
      %c0_85 = arith.constant 0 : index
      %c0_86 = arith.constant 0 : index
      %151 = vector.load %arg24[%c0_84, %c0_85, %c0_86] : memref<1x1x128xf32, #tpu.memory_space<vmem>>, vector<1x1x128xf32>
      %152 = vector.shape_cast %151 : vector<1x1x128xf32> to vector<1x128xf32>
      %153 = vector.shape_cast %150 : vector<1x128xf32> to vector<1x1x128xf32>
      tpu.vector_store %arg24[%c0_84, %c0_85, %c0_86], %153 {strides = array<i32>} : memref<1x1x128xf32, #tpu.memory_space<vmem>>, vector<1x1x128xf32>,
    } else {
    }
    return
  }
  func.func @transform_0(%arg0: i32, %arg1: i32) -> (i32, i32, i32) {
    %c0_i32 = arith.constant 0 : i32
    %c0_i32_0 = arith.constant 0 : i32
    %c0_i32_1 = arith.constant 0 : i32
    return %arg0, %c0_i32, %c0_i32_0 : i32, i32, i32
  }
  func.func @transform_1(%arg0: i32, %arg1: i32) -> (i32, i32, i32, i32) {
    %c0_i32 = arith.constant 0 : i32
    %c0_i32_0 = arith.constant 0 : i32
    %c0_i32_1 = arith.constant 0 : i32
    %c0_i32_2 = arith.constant 0 : i32
    return %arg0, %c0_i32, %c0_i32_0, %c0_i32_1 : i32, i32, i32, i32
  }
  func.func @transform_2(%arg0: i32, %arg1: i32) -> (i32, i32) {
    %c0_i32 = arith.constant 0 : i32
    %c0_i32_0 = arith.constant 0 : i32
    %c0_i32_1 = arith.constant 0 : i32
    return %c0_i32, %c0_i32_0 : i32, i32
  }
  func.func @transform_3(%arg0: i32, %arg1: i32) -> (i32, i32) {
    %c0_i32 = arith.constant 0 : i32
    %c0_i32_0 = arith.constant 0 : i32
    %c0_i32_1 = arith.constant 0 : i32
    return %c0_i32, %c0_i32_0 : i32, i32
  }
  func.func @transform_4(%arg0: i32, %arg1: i32) -> (i32, i32, i32) {
    %c0_i32 = arith.constant 0 : i32
    %c0_i32_0 = arith.constant 0 : i32
    %c0_i32_1 = arith.constant 0 : i32
    return %arg1, %c0_i32, %c0_i32_0 : i32, i32, i32
  }
  func.func @transform_5(%arg0: i32, %arg1: i32) -> (i32, i32, i32) {
    %c0_i32 = arith.constant 0 : i32
    %c0_i32_0 = arith.constant 0 : i32
    %c0_i32_1 = arith.constant 0 : i32
    return %arg1, %c0_i32, %c0_i32_0 : i32, i32, i32
  }
  func.func @transform_6(%arg0: i32, %arg1: i32) -> (i32, i32, i32) {
    %c0_i32 = arith.constant 0 : i32
    %c0_i32_0 = arith.constant 0 : i32
    %c0_i32_1 = arith.constant 0 : i32
    return %arg1, %c0_i32, %c0_i32_0 : i32, i32, i32
  }
  func.func @transform_7(%arg0: i32, %arg1: i32) -> (i32, i32, i32) {
    %c0_i32 = arith.constant 0 : i32
    %c0_i32_0 = arith.constant 0 : i32
    %c0_i32_1 = arith.constant 0 : i32
    return %arg1, %c0_i32, %c0_i32_0 : i32, i32, i32
  }
  func.func @transform_8(%arg0: i32, %arg1: i32) -> (i32, i32, i32) {
    %c0_i32 = arith.constant 0 : i32
    %c0_i32_0 = arith.constant 0 : i32
    %c0_i32_1 = arith.constant 0 : i32
    return %arg1, %c0_i32, %c0_i32_0 : i32, i32, i32
  }
  func.func @transform_9(%arg0: i32, %arg1: i32) -> (i32, i32, i32) {
    %c0_i32 = arith.constant 0 : i32
    %c0_i32_0 = arith.constant 0 : i32
    %c0_i32_1 = arith.constant 0 : i32
    return %arg1, %c0_i32, %c0_i32_0 : i32, i32, i32
  }
  func.func @transform_10(%arg0: i32, %arg1: i32) -> (i32, i32, i32) {
    %c0_i32 = arith.constant 0 : i32
    %c0_i32_0 = arith.constant 0 : i32
    %c0_i32_1 = arith.constant 0 : i32
    return %arg1, %c0_i32, %c0_i32_0 : i32, i32, i32
  }
  func.func @transform_11(%arg0: i32, %arg1: i32) -> (i32, i32, i32) {
    %c0_i32 = arith.constant 0 : i32
    %c0_i32_0 = arith.constant 0 : i32
    %c0_i32_1 = arith.constant 0 : i32
    return %arg1, %c0_i32, %c0_i32_0 : i32, i32, i32
  }
  func.func @transform_12(%arg0: i32, %arg1: i32) -> (i32, i32, i32) {
    %c0_i32 = arith.constant 0 : i32
    %c0_i32_0 = arith.constant 0 : i32
    %c0_i32_1 = arith.constant 0 : i32
    return %arg1, %c0_i32, %c0_i32_0 : i32, i32, i32
  }
  func.func @transform_13(%arg0: i32, %arg1: i32) -> (i32, i32, i32) {
    %c0_i32 = arith.constant 0 : i32
    %c0_i32_0 = arith.constant 0 : i32
    %c0_i32_1 = arith.constant 0 : i32
    return %arg1, %c0_i32, %c0_i32_0 : i32, i32, i32
  }
  func.func @transform_14(%arg0: i32, %arg1: i32) -> (i32, i32, i32) {
    %c0_i32 = arith.constant 0 : i32
    %c0_i32_0 = arith.constant 0 : i32
    %c0_i32_1 = arith.constant 0 : i32
    return %arg1, %c0_i32, %c0_i32_0 : i32, i32, i32
  }
  func.func @transform_15(%arg0: i32, %arg1: i32) -> (i32, i32, i32) {
    %c0_i32 = arith.constant 0 : i32
    %c0_i32_0 = arith.constant 0 : i32
    %c0_i32_1 = arith.constant 0 : i32
    return %arg1, %c0_i32, %c0_i32_0 : i32, i32, i32
  }
  func.func @transform_16(%arg0: i32, %arg1: i32) -> (i32, i32) {
    %c0_i32 = arith.constant 0 : i32
    %c0_i32_0 = arith.constant 0 : i32
    %c0_i32_1 = arith.constant 0 : i32
    return %c0_i32, %c0_i32_0 : i32, i32
  }
  func.func @transform_17(%arg0: i32, %arg1: i32) -> (i32, i32) {
    %c0_i32 = arith.constant 0 : i32
    %c0_i32_0 = arith.constant 0 : i32
    %c0_i32_1 = arith.constant 0 : i32
    return %c0_i32, %c0_i32_0 : i32, i32
  }
  func.func @transform_18(%arg0: i32, %arg1: i32) -> (i32, i32, i32) {
    %c0_i32 = arith.constant 0 : i32
    %c0_i32_0 = arith.constant 0 : i32
    %c0_i32_1 = arith.constant 0 : i32
    %c0_i32_2 = arith.constant 0 : i32
    return %c0_i32, %c0_i32_0, %c0_i32_1 : i32, i32, i32
  }
  func.func @transform_19(%arg0: i32, %arg1: i32) -> (i32, i32, i32) {
    %c0_i32 = arith.constant 0 : i32
    %c0_i32_0 = arith.constant 0 : i32
    %c0_i32_1 = arith.constant 0 : i32
    %c0_i32_2 = arith.constant 0 : i32
    return %c0_i32, %c0_i32_0, %c0_i32_1 : i32, i32, i32
  }
  func.func @transform_20(%arg0: i32, %arg1: i32) -> (i32, i32) {
    %c0_i32 = arith.constant 0 : i32
    %c0_i32_0 = arith.constant 0 : i32
    %c0_i32_1 = arith.constant 0 : i32
    return %c0_i32, %c0_i32_0 : i32, i32
  }
  func.func @transform_21(%arg0: i32, %arg1: i32) -> (i32, i32) {
    %c0_i32 = arith.constant 0 : i32
    %c0_i32_0 = arith.constant 0 : i32
    %c0_i32_1 = arith.constant 0 : i32
    return %c0_i32, %c0_i32_0 : i32, i32
  }
  func.func @transform_22(%arg0: i32, %arg1: i32) -> (i32, i32, i32) {
    %c0_i32 = arith.constant 0 : i32
    %c0_i32_0 = arith.constant 0 : i32
    %c0_i32_1 = arith.constant 0 : i32
    return %arg0, %c0_i32, %c0_i32_0 : i32, i32, i32
  }
}

</mosaic_0001>

<bundles_post_ra>
// kernel: tpu_custom_call.1
= control target key start
LH: loop header
LB: loop body
LE: loop exit
PB: predicated region body
PF: predicated region fallthrough
CT: control target
= control target key end

     0   :  { %s3328_s0 = inlined_call_operand.vmem [shape: f32[2,8,32], index: 0, kind: input, shape index: {}]   ;;  %s3329_s1 = inlined_call_operand.vmem [shape: f32[2,1,1,8], index: 1, kind: input, shape index: {}]   ;;  %s3330_s2 = inlined_call_operand.vmem [shape: f32[1,32], index: 2, kind: input, shape index: {}]   ;;  %s3331_s3 = inlined_call_operand.vmem [shape: f32[1,32], index: 3, kind: input, shape index: {}]   ;;  %s3332_s4 = inlined_call_operand.vmem [shape: bf16[2,96,32], index: 4, kind: input, shape index: {}]   ;;  %s3333_s5 = inlined_call_operand.vmem [shape: f32[2,96,1], index: 5, kind: input, shape index: {}]   ;;  %s3334_s6 = inlined_call_operand.vmem [shape: bf16[2,32,32], index: 6, kind: input, shape index: {}]   ;;  %s3335_s7 = inlined_call_operand.vmem [shape: f32[2,1,32], index: 7, kind: input, shape index: {}]   ;;  %s3336_s8 = inlined_call_operand.vmem [shape: f32[2,1,32], index: 8, kind: input, shape index: {}]   ;;  %s3337_s9 = inlined_call_operand.vmem [shape: f32[2,1,32], index: 9, kind: input, shape index: {}]   ;;  %s3338_s10 = inlined_call_operand.vmem [shape: bf16[2,32,64], index: 10, kind: input, shape index: {}]   ;;  %s3339_s11 = inlined_call_operand.vmem [shape: f32[2,1,64], index: 11, kind: input, shape index: {}]   ;;  %s3340_s12 = inlined_call_operand.vmem [shape: bf16[2,64,32], index: 12, kind: input, shape index: {}]   ;;  %s3341_s13 = inlined_call_operand.vmem [shape: f32[2,1,32], index: 13, kind: input, shape index: {}]   ;;  %s3342_s14 = inlined_call_operand.vmem [shape: f32[2,1,32], index: 14, kind: input, shape index: {}]   ;;  %s3343_s15 = inlined_call_operand.vmem [shape: f32[2,1,32], index: 15, kind: input, shape index: {}]   ;;  %s3344_s16 = inlined_call_operand.vmem [shape: bf16[32,32], index: 16, kind: input, shape index: {}]   ;;  %s3345_s17 = inlined_call_operand.vmem [shape: f32[1,32], index: 17, kind: input, shape index: {}]   ;;  %s3346_s18 = inlined_call_operand.vmem [shape: bf16[1,32,32], index: 18, kind: input, shape index: {}]   ;;  %s3347_s19 = inlined_call_operand.vmem [shape: f32[1,1,32], index: 19, kind: input, shape index: {}]   ;;  %s3348_s20 = inlined_call_operand.vmem [shape: bf16[32,128], index: 20, kind: input, shape index: {}]   ;;  %s3349_s21 = inlined_call_operand.vmem [shape: f32[1,128], index: 21, kind: input, shape index: {}]   ;;  %s3350_s22 = inlined_call_operand.hbm [shape: f32[2,1,128], index: 22, kind: output, shape index: {}]  }
   0x1   :  { %3368 = sst [smem:[#allocation19_spill]] %s3328_s0 }
   0x2   :  { %3369 = sst [smem:[#allocation20_spill]] %s3329_s1 }
   0x3   :  { %3370 = sst [smem:[#allocation21_spill]] %s3330_s2 }
   0x4   :  { %3371 = sst [smem:[#allocation22_spill]] %s3331_s3 }
   0x5   :  { %3372 = sst [smem:[#allocation23_spill]] %s3332_s4 }
   0x6   :  { %3373 = sst [smem:[#allocation24_spill]] %s3333_s5 }
   0x7   :  { %3374 = sst [smem:[#allocation25_spill]] %s3334_s6 }
   0x8   :  { %3375 = sst [smem:[#allocation26_spill]] %s3338_s10 }
   0x9   :  { %3376 = sst [smem:[#allocation27_spill]] %s3343_s15 }
   0xa   :  { %3377 = sst [smem:[#allocation28_spill]] %s3344_s16 }
   0xb   :  { %3378 = sst [smem:[#allocation29_spill]] %s3345_s17 }
   0xc   :  { %3379 = sst [smem:[#allocation30_spill]] %s3346_s18 }
   0xd   :  { %3380 = sst [smem:[#allocation31_spill]] %s3347_s19 }
   0xe   :  { %3381 = sst [smem:[#allocation32_spill]] %s3348_s20 }
   0xf   :  { %3382 = sst [smem:[#allocation33_spill]] %s3349_s21 }
  0x10   :  { %3383 = sst [smem:[#allocation34_spill]] %s3350_s22 }
  0x11   :  { %27 = vsyncpa [#allocation4], 0 }
  0x12   :  { %29 = vsyncpa [#allocation4 + $0x1], 0  ;;  %s2934_s3 = smov 0   ;;  %s2936_s28 = smov 0  }
  0x13   :  { %s2938_s29 = smov 0   ;;  %s2940_s30 = smov 0  }
  0x14   :  { %s2942_s4 = smov 0   ;;  %s2944_s0 = smov 0  }
  0x15   :  { %s2946_s23 = smov 0   ;;  %s2948_s1 = smov 0  }
  0x16 LB: > { %3384 = sst [smem:[#allocation6_spill]] %s2783_s3  ;;  %s2363_s5 = sadd.s32 4294967295, %s2811_s1   ;;  %s2811_s1 = sphi %s2948_s1, %s35_s1   ;;  %s2807_s23 = sphi %s2946_s23, %s3439_s23   ;;  %s2803_s0 = sphi %s2944_s0, %s3438_s0   ;;  %s2799_s4 = sphi %s2942_s4, %s3437_s4   ;;  %s2795_s30 = sphi %s2940_s30, %s3436_s30   ;;  %s2791_s29 = sphi %s2938_s29, %s3435_s29   ;;  %s2787_s28 = sphi %s2936_s28, %s3441_s28   ;;  %s2783_s3 = sphi %s2934_s3, %s3440_s3  }
  0x17   : > { %3385 = sst [smem:[#allocation7_spill]] %s2791_s29  ;;  %s2364_s24 = sadd.s32 4294967294, %s2811_s1  }
  0x18   : > { %3386 = sst [smem:[#allocation8_spill]] %s2795_s30  ;;  %s44_s6 = sadd.s32 1, %s2803_s0 }
  0x19   : > { %3387 = sst [smem:[#allocation9_spill]] %s2799_s4  ;;  %p45_p0 = scmp.ge.s32.totalorder %s44_s6, 2 }
  0x1a   : > { %3388 = sst [smem:[#allocation10_spill]] %s2803_s0  ;;  %s47_s25 = sadd.s32 1, %s2807_s23 }
  0x1b   : > { %3389 = sst [smem:[#allocation11_spill]] %s2807_s23  ;;  %p596_p1 = scmp.ne.s32.totalorder %s2791_s29, %s2787_s28 }
  0x1c   : > { %3390 = sst [smem:[#allocation12_spill]] %s2811_s1  ;;  %p597_p2 = scmp.eq.s32.totalorder %s2363_s5, 3 }
  0x1d   : > { %s3443_s6 = smov (%p45_p0, %s44_s6), 0  ;;  %s3445_s25 = smov (!%p45_p0, %s47_s25), %s2807_s23 }
  0x1e   : > { %3391 = sst [smem:[#allocation13_spill]] %s3443_s6  ;;  %p2983_p3 = por %p597_p2, %p596_p1 }
  0x1f   : > { %p602_p4 = scmp.ne.s32.totalorder %s2787_s28, %s2783_s3  ;;  %p49_p5 = scmp.ge.s32.totalorder %s3445_s25, 2 }
  0x20   : > { %s3392_s26 = scalar_select %p2983_p3, 1, 0 }
  0x21   : > { %p603_p6 = scmp.eq.s32.totalorder %s2364_s24, 3  ;;  %p2367_p7 = scmp.ge.s32.totalorder %s2811_s1, 1 }
  0x22   : > { %3393 = sst [smem:[#allocation14_spill]] %s3392_s26  ;;  %p740_p8 = scmp.lt.s32.totalorder %s2811_s1, 5 }
  0x23   : > { %s3447_s25 = smov (%p49_p5, %s3445_s25), 0  ;;  %p2993_p9 = por %p603_p6, %p602_p4 }
  0x24   : > { %3394 = sst [smem:[#allocation15_spill]] %s3447_s25  ;;  %p741_p10 = pnand %p2367_p7, %p740_p8 }
  0x25   : > { %s3395_s2 = scalar_select %p2993_p9, 1, 0 }
  0x26   : > { %s583_s27 = ssub.s32 %s2807_s23, %s3447_s25  ;;  %s586_s5 = sadd.s32 1, %s2791_s29 }
  0x27   : > { %3396 = sst [smem:[#allocation16_spill]] %s3395_s2  ;;  %p584_p11 = scmp.eq.s32.totalorder %s583_s27, 0 }
  0x28   : > { %744 = sbr.rel (%p741_p10) target bundleno = 3565 (0xded), region = 108 }
  0x29   : > { %s3001_s6 = scalar_select %p584_p11, %s2791_s29, %s586_s5  }
  0x2b   : > { %3397 = sst [smem:[#allocation17_spill]] %s3001_s6 }
  0x2f   : > { %p849_p12 = scmp.lt.s32.totalorder %s2799_s4, 1  ;;  %p856_p13 = scmp.lt.s32.totalorder %s2795_s30, 1 }
  0x30   : > { %s3400_s3 = sld [smem:[#allocation19_spill]]  ;;  %s3401_s17 = sld [smem:[#allocation23_spill]] }
  0x31   : > { %s3007_s0 = scalar_select %p849_p12, %s2799_s4, 1 }
  0x32   : > { %s3010_s2 = scalar_select %p856_p13, %s2795_s30, 1 }
  0x33   : > { %3398 = sst [smem:[#allocation18_spill]] %s3007_s0  ;;  %s2368_s27 = sshll.u32 %s3007_s0, 3 }
  0x34   : > { %s2593_s22 = smul.u32 48, %s3010_s2  ;;  %s2432_s4 = sshll.u32 %s3010_s2, 4 }
  0x35   : > { %s2594_s26 = smul.u32 96, %s3010_s2  ;;  %s3402_s30 = sld [smem:[#allocation25_spill]] }
  0x36   : > { %s852_s1 = scalar_lea.vmem %s3400_s3, %s2368_s27  ;;  %s3026_s20 = scalar_lea.vmem %s3401_s17, %s2593_s22 }
  0x37   : > { %s3403_s29 = sld [smem:[#allocation24_spill]]  ;;  %s3404_s10 = sld [smem:[#allocation26_spill]] }
  0x38   : > { %s895_s23 = scalar_lea.vmem %s3341_s13, %s3010_s2  ;;  %s898_s16 = scalar_lea.vmem %s3342_s14, %s3010_s2 }
  0x39   : > { %s3405_s22 = sld [smem:[#allocation27_spill]]  ;;  %s3406_s25 = sand.u32 1, %s2787_s28  }
  0x3a   : > { %s3407_s5 = sld [smem:[#allocation8_spill]] }
  0x3b   : > { %s3031_s24 = scalar_lea.vmem %s3402_s30, %s2432_s4 }
  0x3d   : > { %s3036_s6 = scalar_lea.vmem %s3403_s29, %s2594_s26  ;;  %s3053_s30 = scalar_lea.vmem %s3404_s10, %s2432_s4 }
  0x3e   : > { %s2434_s29 = sshll.u32 %s3010_s2, 5  ;;  %s3079_s26 = scalar_lea.vmem [#allocation3], %s3406_s25 }
  0x3f   : > { %s3067_s19 = scalar_lea.vmem %s3340_s12, %s2434_s29  ;;  %s901_s10 = scalar_lea.vmem %s3405_s22, %s3010_s2 }
  0x40   : > { %p2377_p0 = scmp.ne.s32.totalorder %s3407_s5, 0 }
  0x41   : > { %v907_v0 = vld [vmem:[%s852_s1] sm:$0xff] (!%p2377_p0)  ;;  %vm910_vm0 = vcmask (!%p2377_p0), 261120   ;;  %s3408_s29 = sld [smem:[#allocation21_spill]] (!%p2377_p0)  ;;  %s3409_s27 = sld [smem:[#allocation22_spill]] (!%p2377_p0) }
  0x42   : > { %906 = sbr.rel (%p2377_p0) target bundleno = 380 (0x17c), region = 112  ;;  %v911_v1 = vsel (!%p2377_p0), %vm910_vm0, %v907_v0, 0.0 }
  0x43   : > { %912 = vadd.xlane.f32.xlu0 (!%p2377_p0), %v911_v1 }
  0x47   : > { %v2378_v11 = vld [vmem:[%s3408_s29] ss:$0 sm:$0xff] (!%p2377_p0) }
  0x48   : > { %v2379_v13 = vld [vmem:[%s3409_s27] ss:$0 sm:$0xff] (!%p2377_p0) }
  0xd0   : > { %v913_v2 = vpop.xlane.xlu0 %912 }
  0xd1   : > { %v915_v3 = vmul.f32 0.03125, %v913_v2 }
  0xd3   : > { %v916_v4 = vsub.f32 %v907_v0, %v915_v3 }
  0xd5   : > { %v917_v5 = vmul.f32 %v916_v4, %v916_v4 }
  0xd7   : > { %v918_v6 = vsel %vm910_vm0, %v917_v5, 0.0 }
  0xd8   : > { %919 = vadd.xlane.f32.xlu0 %v918_v6 }
 0x165   : > { %v920_v7 = vpop.xlane.xlu0 %919 }
 0x166   : > { %v921_v8 = vmul.f32 0.03125, %v920_v7 }
 0x168   : > { %v922_v9 = vadd.f32 1e-12, %v921_v8 }
 0x16a   : > { %2671 = vrsqrt.f32 %v922_v9 }
 0x174   : > { %v2672_v10 = vpop.eup %2671 }
 0x175   : > { %v924_v12 = vmul.f32 %v2672_v10, %v916_v4 }
 0x177   : > { %v931_v14 = vmul.f32 %v2378_v11, %v924_v12 }
 0x179   : > { %v938_v15 = vadd.f32 %v2379_v13, %v931_v14 }
 0x17b   : > { %939 = vst.msk [vmem:[#allocation2] sm:$0xff] %vm910_vm0, %v938_v15 }
 0x17c PF: > { %vm1056_vm1 = vcmask 261120   ;;  %v2675_v18 = vld [vmem:[%s3026_s20] sm:$0xff]   ;;  %v2813_v19 = vmov 0   ;;  %v2676_v22 = vld [vmem:[%s3026_s20 + $0x8] sm:$0xff]   ;;  %v956_v23 = vld [vmem:[%s3036_s6 + $0x10] sm:$0xff]  ;;  %v2814_v32 = vmov 0.0   ;;  %s3413_s4 = scalar_lea.vmem %s3335_s7, %s3010_s2  ;;  %s3414_s22 = scalar_lea.vmem %s3336_s8, %s3010_s2 }
 0x17d   : > { %2673 = vset.pattern.permute.xlu0 %v2813_v19  ;;  %2674 = vset.pattern.permute.xlu1 %v2813_v19  ;;  %v954_v21 = vld [vmem:[%s3036_s6] sm:$0xff]  ;;  %v2677_v24 = vld [vmem:[%s3026_s20 + $0x10] sm:$0xff]   ;;  %v955_v25 = vld [vmem:[%s3036_s6 + $0x8] sm:$0xff]  ;;  %vm2815_vm2 = vmmov 0   ;;  %vm1194_vm3 = vcmask 1043456   ;;  %vm1190_vm4 = vcmask 64512   ;;  %s3416_s27 = scalar_lea.vmem %s3339_s11, %s3010_s2 }
 0x17e   : > { %2480 = vmatprep.mubr.msk.bf16.mxu0 %vm1056_vm1, %v2675_v18  ;;  %968 = vperm.xlu0 %2673, %v954_v21   ;;  %v957_v26 = vld [vmem:[%s3036_s6 + $0x18] sm:$0xff]  ;;  %v958_v27 = vld [vmem:[%s3036_s6 + $0x20] sm:$0xff]  ;;  %v959_v28 = vld [vmem:[%s3036_s6 + $0x28] sm:$0xff]  ;;  %s3411_s17 = sld [smem:[#allocation20_spill]]  ;;  %vm1887_vm5 = vcmask 523264  }
 0x17f   : > { %978 = vperm.xlu1 %2674, %v956_v23   ;;  %v960_v29 = vld [vmem:[%s3036_s6 + $0x30] sm:$0xff]  ;;  %v2678_v30 = vld [vmem:[%s3026_s20 + $0x18] sm:$0xff]   ;;  %2492 = vmatprep.subr.bf16.mxu1 %v2814_v32  ;;  %v2679_v47 = vld [vmem:[%s3026_s20 + $0x20] sm:$0xff]  }
 0x180   : > { %v961_v31 = vld [vmem:[%s3036_s6 + $0x38] sm:$0xff]  ;;  %2494 = vmatprep.mubr.msk.bf16.mxu1 %vm2815_vm2, %v2814_v32  ;;  %v2680_v48 = vld [vmem:[%s3026_s20 + $0x28] sm:$0xff]   ;;  %s3410_s20 = sld [smem:[#allocation18_spill]] }
 0x182   : > { %v3091_v16 = vld [vmem:[#allocation2] sm:$0xff]  ;;  %973 = vperm.xlu0 %2673, %v955_v25  }
 0x183   : > { %v953_v17 = vpack.c.bf16 %v3091_v16, %v3091_v16  ;;  %983 = vperm.xlu1 %2674, %v957_v26  }
 0x185   : > { %2592 = vmatprep.subr.msk.bf16.mxu0 %vm1056_vm1, %v953_v17  ;;  %v1076_v20 = vsel %vm1056_vm1, %v953_v17, 0 }
 0x186   : > { %2479 = vmatpush3.bf16.xpose.msra.mxu0 %v1076_v20  ;;  %988 = vperm.xlu0 %2673, %v958_v27   ;;  %s3412_s21 = scalar_lea.vmem %s3411_s17, %s3410_s20 }
 0x187   : > { %993 = vperm.xlu1 %2674, %v959_v28   ;;  %2528 = vmatprep.subr.bf16.mxu0 %v2814_v32  ;;  %v2392_v11 = vld [vmem:[%s3412_s21] ss:$0 sm:$0xff] }
 0x18a   : > { %998 = vperm.xlu0 %2673, %v960_v29  }
 0x18b   : > { %1003 = vperm.xlu1 %2674, %v961_v31  }
 0x18d   : > { %2481 = vmatmul.mubr.msk.bf16.vlgmr.msra.gmra.mrb[0].mxu0 %vm1056_vm1, %v2676_v22 }
 0x18e   : > { %2484 = vmatprep.mubr.msk.bf16.mxu0 %vm1056_vm1, %v2677_v24 }
 0x195   : > { %2485 = vmatmul.mubr.msk.bf16.gmra.mrb[4].mxu0 %vm1056_vm1, %v2678_v30 }
 0x196   : > { %2488 = vmatprep.mubr.msk.bf16.mxu0 %vm1056_vm1, %v2679_v47 }
 0x19d   : > { %2489 = vmatmul.mubr.msk.bf16.gmra.mrb[8].mxu0 %vm1056_vm1, %v2680_v48 }
 0x19e   : > { %2530 = vmatprep.mubr.msk.bf16.mxu0 %vm2815_vm2, %v2814_v32 }
 0x1fd   : > { %v969_v33 = vpop.permute.xlu0 %968 }
 0x1fe   : > { %v979_v34 = vpop.permute.xlu1 %978 }
 0x201   : > { %v974_v35 = vpop.permute.xlu0 %973 }
 0x202   : > { %v984_v36 = vpop.permute.xlu1 %983 }
 0x205   : > { %v989_v38 = vpop.permute.xlu0 %988 }
 0x206   : > { %v994_v42 = vpop.permute.xlu1 %993 }
 0x209   : > { %v999_v50 = vpop.permute.xlu0 %998 }
 0x20a   : > { %v1004_v54 = vpop.permute.xlu1 %1003 }
 0x260   : > { %v2482_v37 = vpop.f32.mrb[0].mxu0 }
 0x261   : > { %v1112_v39 = vpop.f32.mrb[1].mxu0  ;;  %v1121_v44 = vadd.f32 %v2482_v37, %v979_v34 }
 0x262   : > { %v1113_v40 = vadd.f32 %v1112_v39, %v969_v33  ;;  %v2483_v41 = vpop.f32.mrb[2].mxu0 }
 0x263   : > { %v1115_v43 = vpop.f32.mrb[3].mxu0  ;;  %v1161_v51 = vpack.c.bf16 %v1121_v44, %v1121_v44  ;;  %v1124_v52 = vadd.f32 %v2483_v41, %v984_v36 }
 0x264   : > { %v1159_v45 = vpack.c.bf16 %v1113_v40, %v1113_v40  ;;  %v1116_v46 = vadd.f32 %v1115_v43, %v974_v35 }
 0x265   : > { %v1162_v62 = vpack.c.bf16 %v1124_v52, %v1124_v52 }
 0x266   : > { %v1160_v49 = vpack.c.bf16 %v1116_v46, %v1116_v46  ;;  %1174 = vxpose.xlu0.c.b16.start.end [1/1] (short) (narrow) %v1159_v45, 16 }
 0x268   : > { %v2486_v53 = vpop.f32.mrb[4].mxu0  ;;  %1238 = vxpose.xlu1.c.b16.start.end [1/1] (short) (narrow) %v1160_v49, 16 }
 0x269   : > { %v1137_v55 = vadd.f32 %v2486_v53, %v999_v50  ;;  %v1128_v56 = vpop.f32.mrb[5].mxu0 }
 0x26a   : > { %v1129_v57 = vadd.f32 %v1128_v56, %v989_v38  ;;  %1300 = vxpose.xlu0.c.b16.start.end [1/1] (short) (narrow) %v1161_v51, 16  ;;  %v2487_v58 = vpop.f32.mrb[6].mxu0  ;;  %v962_v38 = vld [vmem:[%s3036_s6 + $0x40] sm:$0xff] }
 0x26b   : > { %v1165_v59 = vpack.c.bf16 %v1137_v55, %v1137_v55  ;;  %v1140_v60 = vadd.f32 %v2487_v58, %v1004_v54  ;;  %v1131_v61 = vpop.f32.mrb[7].mxu0 }
 0x26c   : > { %v1163_v63 = vpack.c.bf16 %v1129_v57, %v1129_v57  ;;  %v1132_v0 = vadd.f32 %v1131_v61, %v994_v42  ;;  %v964_v61 = vld [vmem:[%s3036_s6 + $0x50] sm:$0xff] }
 0x26d   : > { %v1320_v1 = vsel %vm1194_vm3, %v1165_v59, 0  ;;  %v1166_v2 = vpack.c.bf16 %v1140_v60, %v1140_v60 }
 0x26e   : > { %1362 = vxpose.xlu0.c.b16.start.end [1/1] (short) (narrow) %v1162_v62, 16  ;;  %v1196_v3 = vsel %vm1194_vm3, %v1163_v63, 0  ;;  %v1164_v4 = vpack.c.bf16 %v1132_v0, %v1132_v0  ;;  %v965_v62 = vld [vmem:[%s3036_s6 + $0x58] sm:$0xff] }
 0x26f   : > { %2493 = vmatpush3.bf16.msra.mxu1 %v1196_v3  ;;  %v1382_v5 = vsel %vm1194_vm3, %v1166_v2, 0 }
 0x270   : > { %v1258_v6 = vsel %vm1194_vm3, %v1164_v4, 0  ;;  %2498 = vmatprep.subr.bf16.mxu1 %v2814_v32  ;;  %v3153_v39 = vpop.f32.mrb[8].mxu0 }
 0x271   : > { %v1144_v40 = vpop.f32.mrb[9].mxu0 }
 0x272   : > { %v2491_v63 = vpop.f32.mrb[10].mxu0 }
 0x273   : > { %v1147_v0 = vpop.f32.mrb[11].mxu0 }
 0x2cc   : > { %v1182_v7 = vpop.trf.xlu0 }
 0x2cd   : > { %2495 = vmatmul.mubr.msk.bf16.vlgmr.msra.gmra.mrb[0].mxu1 %vm1190_vm4, %v1182_v7 }
 0x2ce   : > { %2499 = vmatpush3.bf16.msra.mxu1 %v1258_v6  ;;  %2500 = vmatprep.mubr.msk.bf16.mxu1 %vm2815_vm2, %v2814_v32  ;;  %v1246_v8 = vpop.trf.xlu1 }
 0x2cf   : > { %2504 = vmatprep.subr.bf16.mxu1 %v2814_v32 }
 0x2d0   : > { %v1308_v9 = vpop.trf.xlu0 }
 0x2d4   : > { %v1370_v10 = vpop.trf.xlu0 }
 0x2d5   : > { %2501 = vmatmul.mubr.msk.bf16.vlgmr.msra.gmra.mrb[4].mxu1 %vm1190_vm4, %v1246_v8 }
 0x2d6   : > { %2505 = vmatpush3.bf16.msra.mxu1 %v1320_v1  ;;  %2506 = vmatprep.mubr.msk.bf16.mxu1 %vm2815_vm2, %v2814_v32  ;;  %v963_v1 = vld [vmem:[%s3036_s6 + $0x48] sm:$0xff] }
 0x2d7   : > { %2510 = vmatprep.subr.bf16.mxu1 %v2814_v32 }
 0x2dd   : > { %2507 = vmatmul.mubr.msk.bf16.vlgmr.msra.gmra.mrb[8].mxu1 %vm1190_vm4, %v1308_v9 }
 0x2de   : > { %2511 = vmatpush3.bf16.msra.mxu1 %v1382_v5  ;;  %2512 = vmatprep.mubr.msk.bf16.mxu1 %vm2815_vm2, %v2814_v32 }
 0x2df   : > { %2516 = vmatprep.subr.bf16.mxu1 %v2814_v32 }
 0x2e5   : > { %2513 = vmatmul.mubr.msk.bf16.vlgmr.msra.gmra.mrb[12].mxu1 %vm1190_vm4, %v1370_v10 }
 0x2e6   : > { %2518 = vmatprep.mubr.msk.bf16.mxu1 %vm2815_vm2, %v2814_v32 }
 0x3a0   : > { %v1232_v12 = vpop.f32.mrb[0].mxu1 }
 0x3a1   : > { %v1233_v13 = vadd.f32 %v2392_v11, %v1232_v12  ;;  %v2496_v14 = vpop.f32.mrb[1].mxu1 }
 0x3a2   : > { %v1235_v15 = vpop.f32.mrb[2].mxu1 }
 0x3a3   : > { %v2497_v17 = vpop.f32.mrb[3].mxu1  ;;  %v1424_v18 = vsel %vm1190_vm4, %v1233_v13, -inf }
 0x3a4   : > { %1425 = vmax.xlane.f32.xlu1 %v1424_v18 }
 0x3a8   : > { %v1294_v19 = vpop.f32.mrb[4].mxu1 }
 0x3a9   : > { %v1295_v20 = vadd.f32 %v2392_v11, %v1294_v19  ;;  %v2502_v21 = vpop.f32.mrb[5].mxu1 }
 0x3aa   : > { %v1297_v22 = vpop.f32.mrb[6].mxu1 }
 0x3ab   : > { %v2503_v23 = vpop.f32.mrb[7].mxu1  ;;  %v1427_v24 = vsel %vm1190_vm4, %v1295_v20, -inf }
 0x3ac   : > { %1428 = vmax.xlane.f32.xlu0 %v1427_v24 }
 0x3b0   : > { %v1356_v25 = vpop.f32.mrb[8].mxu1 }
 0x3b1   : > { %v1357_v26 = vadd.f32 %v2392_v11, %v1356_v25  ;;  %v2508_v27 = vpop.f32.mrb[9].mxu1 }
 0x3b2   : > { %v1359_v28 = vpop.f32.mrb[10].mxu1 }
 0x3b3   : > { %v2509_v29 = vpop.f32.mrb[11].mxu1  ;;  %v1430_v30 = vsel %vm1190_vm4, %v1357_v26, -inf }
 0x3b4   : > { %1431 = vmax.xlane.f32.xlu1 %v1430_v30 }
 0x3b8   : > { %v1418_v31 = vpop.f32.mrb[12].mxu1 }
 0x3b9   : > { %v1419_v33 = vadd.f32 %v2392_v11, %v1418_v31  ;;  %v2514_v34 = vpop.f32.mrb[13].mxu1 }
 0x3ba   : > { %v1421_v35 = vpop.f32.mrb[14].mxu1 }
 0x3bb   : > { %v1433_v36 = vsel %vm1190_vm4, %v1419_v33, -inf  ;;  %v2515_v37 = vpop.f32.mrb[15].mxu1 }
 0x3bc   : > { %1434 = vmax.xlane.f32.xlu0 %v1433_v36  ;;  %v2681_v36 = vld [vmem:[%s3031_s24] sm:$0xff]   ;;  %v2682_v37 = vld [vmem:[%s3031_s24 + $0x8] sm:$0xff]   ;;  %s3418_s24 = sld [smem:[#allocation8_spill]] }
 0x3c2   : > { %p2419_p1 = scmp.ne.s32.totalorder %s3418_s24, 1 }
 0x3c3   : > { %s3419_s18 = sld [smem:[#allocation28_spill]] (!%p2419_p1)  ;;  %vm2817_vm6 = vmmov (!%p2419_p1), 0   ;;  %s3421_s3 = sld [smem:[#allocation32_spill]] (!%p2419_p1) }
 0x3c4   : > { %s3424_s24 = sld [smem:[#allocation31_spill]] (!%p2419_p1) }
 0x3c5   : > { %1008 = vperm.xlu1 %2674, %v962_v38  }
 0x431   : > { %v1426_v41 = vpop.xlane.xlu1 %1425 }
 0x432   : > { %v1436_v42 = vsub.f32 %v1233_v13, %v1426_v41 }
 0x434   : > { %v1440_v43 = vmul.f32 1.442695, %v1436_v42 }
 0x436   : > { %2689 = vpow2.f32 %v1440_v43 }
 0x439   : > { %v1429_v44 = vpop.xlane.xlu0 %1428 }
 0x43a   : > { %v1437_v45 = vsub.f32 %v1295_v20, %v1429_v44 }
 0x43c   : > { %v1442_v46 = vmul.f32 1.442695, %v1437_v45 }
 0x43e   : > { %2691 = vpow2.f32 %v1442_v46 }
 0x440   : > { %v2690_v47 = vpop.eup %2689 }
 0x441   : > { %v1432_v48 = vpop.xlane.xlu1 %1431  ;;  %v1448_v49 = vsel %vm1190_vm4, %v2690_v47, 0.0 }
 0x442   : > { %v1438_v50 = vsub.f32 %v1357_v26, %v1432_v48  ;;  %1449 = vadd.xlane.f32.xlu1 %v1448_v49 }
 0x444   : > { %v1444_v51 = vmul.f32 1.442695, %v1438_v50 }
 0x445   : > { %v1009_v2 = vpop.permute.xlu1 %1008 }
 0x446   : > { %2693 = vpow2.f32 %v1444_v51  ;;  %v1145_v10 = vadd.f32 %v1144_v40, %v1009_v2 }
 0x448   : > { %v2692_v52 = vpop.eup %2691  ;;  %v1468_v13 = vpack.c.bf16 %v1145_v10, %v1145_v10 }
 0x449   : > { %v1435_v53 = vpop.xlane.xlu0 %1434  ;;  %v1451_v54 = vsel %vm1190_vm4, %v2692_v52, 0.0 }
 0x44a   : > { %v1439_v55 = vsub.f32 %v1419_v33, %v1435_v53  ;;  %1452 = vadd.xlane.f32.xlu0 %v1451_v54 }
 0x44c   : > { %v1446_v56 = vmul.f32 1.442695, %v1439_v55 }
 0x44e   : > { %2695 = vpow2.f32 %v1446_v56 }
 0x450   : > { %v2694_v57 = vpop.eup %2693 }
 0x451   : > { %v1454_v58 = vsel %vm1190_vm4, %v2694_v57, 0.0 }
 0x452   : > { %1455 = vadd.xlane.f32.xlu1 %v1454_v58 }
 0x458   : > { %v2696_v59 = vpop.eup %2695 }
 0x459   : > { %v1457_v60 = vsel %vm1190_vm4, %v2696_v59, 0.0 }
 0x45a   : > { %1458 = vadd.xlane.f32.xlu0 %v1457_v60 }
 0x463   : > { %1018 = vperm.xlu1 %2674, %v964_v61  }
 0x467   : > { %1023 = vperm.xlu1 %2674, %v965_v62  }
 0x470   : > { %1013 = vperm.xlu0 %2673, %v963_v1  }
 0x4cf   : > { %v1450_v3 = vpop.xlane.xlu1 %1449 }
 0x4d0   : > { %2697 = vrcp.f32 %v1450_v3 }
 0x4d7   : > { %v1453_v4 = vpop.xlane.xlu0 %1452 }
 0x4d8   : > { %2699 = vrcp.f32 %v1453_v4 }
 0x4da   : > { %v2698_v5 = vpop.eup %2697 }
 0x4db   : > { %v1464_v6 = vmul.f32 %v2698_v5, %v2690_v47 }
 0x4dd   : > { %v1472_v7 = vpack.c.bf16 %v1464_v6, %v1464_v6  ;;  %v2683_v6 = vld [vmem:[%s3053_s30] sm:$0xff]  }
 0x4df   : > { %v1456_v8 = vpop.xlane.xlu1 %1455  ;;  %v1480_v9 = vsel %vm1190_vm4, %v1472_v7, 0  ;;  %v2684_v7 = vld [vmem:[%s3053_s30 + $0x8] sm:$0xff]   ;;  %s3415_s30 = scalar_lea.vmem %s3337_s9, %s3010_s2 }
 0x4e0   : > { %2701 = vrcp.f32 %v1456_v8  ;;  %2517 = vmatpush3.bf16.xpose.msra.mxu1 %v1480_v9 }
 0x4e1   : > { %2522 = vmatprep.subr.bf16.mxu1 %v2814_v32 }
 0x4e2   : > { %v2700_v11 = vpop.eup %2699 }
 0x4e3   : > { %v1465_v12 = vmul.f32 %v2700_v11, %v2692_v52  ;;  %v1019_v21 = vpop.permute.xlu1 %1018  ;;  %v2405_v11 = vld [vmem:[%s3414_s22] ss:$0 sm:$0xff]  ;;  %s3420_s22 = sld [smem:[#allocation30_spill]] (!%p2419_p1) }
 0x4e4   : > { %v1153_v25 = vadd.f32 %v3153_v39, %v1019_v21  ;;  %v2688_v21 = vld [vmem:[%s3067_s19 + $0x18] sm:$0xff]  }
 0x4e5   : > { %v1473_v14 = vpack.c.bf16 %v1465_v12, %v1465_v12 }
 0x4e6   : > { %v1470_v29 = vpack.c.bf16 %v1153_v25, %v1153_v25 }
 0x4e7   : > { %2519 = vmatmul.mubr.msk.bf16.vlgmr.msra.gmra.mrb[16].mxu1 %vm1190_vm4, %v1468_v13  ;;  %v1459_v15 = vpop.xlane.xlu0 %1458  ;;  %v1526_v17 = vsel %vm1190_vm4, %v1473_v14, 0  ;;  %v1024_v31 = vpop.permute.xlu1 %1023  ;;  %v2406_v13 = vld [vmem:[%s3415_s30] ss:$0 sm:$0xff] }
 0x4e8   : > { %2703 = vrcp.f32 %v1459_v15  ;;  %2523 = vmatpush3.bf16.xpose.msra.mxu1 %v1526_v17  ;;  %2524 = vmatprep.mubr.msk.bf16.mxu1 %vm2815_vm2, %v2814_v32  ;;  %v1156_v34 = vadd.f32 %v2491_v63, %v1024_v31 }
 0x4e9   : > { %2534 = vmatprep.subr.bf16.mxu1 %v2814_v32 }
 0x4ea   : > { %v2702_v18 = vpop.eup %2701  ;;  %v1471_v35 = vpack.c.bf16 %v1156_v34, %v1156_v34  ;;  %v2411_v34 = vld [vmem:[%s895_s23] ss:$0 sm:$0xff]  ;;  %s3423_s23 = sld [smem:[#allocation29_spill]] (!%p2419_p1) }
 0x4eb   : > { %v1466_v19 = vmul.f32 %v2702_v18, %v2694_v57  ;;  %v2401_v57 = vld [vmem:[%s3413_s4] ss:$0 sm:$0xff] }
 0x4ec   : > { %v2685_v18 = vld [vmem:[%s3067_s19] sm:$0xff]  }
 0x4ed   : > { %v1474_v20 = vpack.c.bf16 %v1466_v19, %v1466_v19  ;;  %v2686_v19 = vld [vmem:[%s3067_s19 + $0x8] sm:$0xff]  }
 0x4ef   : > { %v1014_v22 = vpop.permute.xlu0 %1013  ;;  %v1572_v23 = vsel %vm1190_vm4, %v1474_v20, 0  ;;  %v2687_v20 = vld [vmem:[%s3067_s19 + $0x10] sm:$0xff]  }
 0x4f0   : > { %v1148_v24 = vadd.f32 %v1147_v0, %v1014_v22  ;;  %2529 = vmatpush3.bf16.xpose.msra.mxu0 %v1572_v23  ;;  %v2407_v22 = vld [vmem:[%s3416_s27] ss:$0 sm:$0xff]  ;;  %s3422_s27 = smov (!%p2419_p1), %s3421_s3 }
 0x4f1   : > { %2540 = vmatprep.subr.bf16.mxu0 %v2814_v32 }
 0x4f2   : > { %v2704_v26 = vpop.eup %2703  ;;  %v1469_v27 = vpack.c.bf16 %v1148_v24, %v1148_v24 }
 0x4f3   : > { %v1467_v28 = vmul.f32 %v2704_v26, %v2696_v59 }
 0x4f4   : > { %2525 = vmatmul.mubr.msk.bf16.vlgmr.msra.gmra.mrb[20].mxu1 %vm1190_vm4, %v1469_v27 }
 0x4f5   : > { %v1475_v30 = vpack.c.bf16 %v1467_v28, %v1467_v28  ;;  %2536 = vmatprep.mubr.msk.bf16.mxu1 %vm2815_vm2, %v2814_v32 }
 0x4f7   : > { %2531 = vmatmul.mubr.msk.bf16.vlgmr.msra.gmra.mrb[12].mxu0 %vm1190_vm4, %v1470_v29  ;;  %v1618_v33 = vsel %vm1190_vm4, %v1475_v30, 0 }
 0x4f8   : > { %2535 = vmatpush3.bf16.xpose.msra.mxu1 %v1618_v33  ;;  %2544 = vmatprep.mubr.msk.bf16.mxu0 %vm2815_vm2, %v2814_v32 }
 0x4f9   : > { %2548 = vmatprep.subr.bf16.mxu1 %v2814_v32  ;;  %2541 = vmatpush3.bf16.msra.mxu0 %v2681_v36 }
 0x4fa   : > { %2542 = vmatprep.subr.bf16.mxu0 %v2814_v32 }
 0x4fd   : > { %2543 = vmatpush3.bf16.msra.mxu0 %v2682_v37 }
 0x4fe   : > { %2556 = vmatprep.subr.bf16.mxu0 %v2814_v32 }
 0x4ff   : > { %2537 = vmatmul.mubr.msk.bf16.vlgmr.msra.gmra.mrb[24].mxu1 %vm1190_vm4, %v1471_v35 }
 0x500   : > { %2552 = vmatprep.mubr.msk.bf16.mxu1 %vm2815_vm2, %v2814_v32  ;;  %2549 = vmatpush3.bf16.msra.mxu1 %v2683_v6 }
 0x501   : > { %2550 = vmatprep.subr.bf16.mxu1 %v2814_v32 }
 0x504   : > { %2551 = vmatpush3.bf16.msra.mxu1 %v2684_v7  ;;  %v2716_v7 = vld [vmem:[%s3422_s27 + $0x8] sm:$0xff] (!%p2419_p1)  }
 0x5ba   : > { %v1516_v38 = vpop.f32.mrb[16].mxu1 }
 0x5bb   : > { %v2520_v39 = vpop.f32.mrb[17].mxu1 }
 0x5bc   : > { %v1519_v40 = vpop.f32.mrb[18].mxu1 }
 0x5bd   : > { %v2521_v41 = vpop.f32.mrb[19].mxu1 }
 0x5c7   : > { %v1562_v42 = vpop.f32.mrb[20].mxu1 }
 0x5c8   : > { %v1660_v43 = vpack.c.bf16 %v1562_v42, %v1516_v38  ;;  %v2526_v44 = vpop.f32.mrb[21].mxu1 }
 0x5c9   : > { %v1565_v45 = vpop.f32.mrb[22].mxu1 }
 0x5ca   : > { %v1608_v46 = vpop.f32.mrb[12].mxu0  ;;  %1673 = vxpose.xlu0.c.b16.start [1/2] (short) (narrow) %v1660_v43, 16  ;;  %v2527_v47 = vpop.f32.mrb[23].mxu1 }
 0x5cb   : > { %v2532_v48 = vpop.f32.mrb[13].mxu0 }
 0x5cc   : > { %v1611_v49 = vpop.f32.mrb[14].mxu0 }
 0x5cd   : > { %v2533_v50 = vpop.f32.mrb[15].mxu0 }
 0x5d2   : > { %v1654_v51 = vpop.f32.mrb[24].mxu1 }
 0x5d3   : > { %v1661_v52 = vpack.c.bf16 %v1654_v51, %v1608_v46  ;;  %v2538_v53 = vpop.f32.mrb[25].mxu1  ;;  %v2417_v51 = vld [vmem:[%s898_s16] ss:$0 sm:$0xff]  ;;  %s3425_s16 = sld [smem:[#allocation33_spill]] (!%p2419_p1) }
 0x5d4   : > { %v1657_v54 = vpop.f32.mrb[26].mxu1  ;;  %v2418_v53 = vld [vmem:[%s901_s10] ss:$0 sm:$0xff] }
 0x5d5   : > { %1674 = vxpose.xlu0.c.b16.end [2/2] (short) (narrow) %v1661_v52, 16  ;;  %v2539_v55 = vpop.f32.mrb[27].mxu1 }
 0x637   : > { %v1681_v56 = vpop.trf.xlu0 }
 0x638   : > { %2545 = vmatmul.mubr.msk.bf16.vlgmr.msra.gmra.mrb[16].mxu0 %vm1056_vm1, %v1681_v56  ;;  %v2711_v56 = vld [vmem:[%s3419_s18] sm:$0xff] (!%p2419_p1)  }
 0x639   : > { %2564 = vmatprep.mubr.msk.bf16.mxu0 %vm2815_vm2, %v2814_v32  ;;  %2557 = vmatpush3.bf16.msra.mxu0 %v2685_v18 }
 0x63a   : > { %2558 = vmatprep.subr.bf16.mxu0 %v2814_v32 }
 0x63d   : > { %2559 = vmatpush3.bf16.msra.mxu0 %v2686_v19 }
 0x63e   : > { %2560 = vmatprep.subr.bf16.mxu0 %v2814_v32 }
 0x641   : > { %2561 = vmatpush3.bf16.msra.mxu0 %v2687_v20 }
 0x642   : > { %2562 = vmatprep.subr.bf16.mxu0 %v2814_v32 }
 0x645   : > { %2563 = vmatpush3.bf16.msra.mxu0 %v2688_v21 }
 0x70b   : > { %v1738_v58 = vpop.f32.mrb[16].mxu0 }
 0x70c   : > { %v1739_v59 = vadd.f32 %v2401_v57, %v1738_v58  ;;  %v2546_v60 = vpop.f32.mrb[17].mxu0  ;;  %v2816_v57 = vmov (!%p2419_p1), 0.0   ;;  %v2712_v58 = vld [vmem:[%s3419_s18 + $0x8] sm:$0xff] (!%p2419_p1)  }
 0x70d   : > { %v1741_v61 = vpop.f32.mrb[18].mxu0  ;;  %2568 = vmatprep.subr.bf16.mxu0 (!%p2419_p1), %v2816_v57  ;;  %2576 = vmatprep.subr.bf16.mxu1 (!%p2419_p1), %v2816_v57  ;;  %v2713_v60 = vld [vmem:[%s3420_s22] sm:$0xff] (!%p2419_p1)  }
 0x70e   : > { %v1744_v62 = vadd.f32 %v1739_v59, %v3091_v16  ;;  %v2547_v63 = vpop.f32.mrb[19].mxu0  ;;  %v2714_v61 = vld [vmem:[%s3420_s22 + $0x8] sm:$0xff] (!%p2419_p1)  }
 0x70f   : > { %v1971_v63 = vld [vmem:[%s3423_s23] sm:$0x1] (!%p2419_p1) }
 0x710   : > { %v1747_v0 = vsel %vm1056_vm1, %v1744_v62, 0.0 }
 0x711   : > { %1748 = vadd.xlane.f32.xlu1 %v1747_v0 }
 0x79e   : > { %v1749_v1 = vpop.xlane.xlu1 %1748 }
 0x79f   : > { %v1751_v2 = vmul.f32 0.03125, %v1749_v1 }
 0x7a1   : > { %v1752_v3 = vsub.f32 %v1744_v62, %v1751_v2  ;;  %v2715_v62 = vld [vmem:[%s3421_s3] sm:$0xff] (!%p2419_p1)  }
 0x7a3   : > { %v1753_v4 = vmul.f32 %v1752_v3, %v1752_v3 }
 0x7a5   : > { %v1754_v5 = vsel %vm1056_vm1, %v1753_v4, 0.0 }
 0x7a6   : > { %1755 = vadd.xlane.f32.xlu0 %v1754_v5 }
 0x833   : > { %v1756_v16 = vpop.xlane.xlu0 %1755 }
 0x834   : > { %v1757_v8 = vmul.f32 0.03125, %v1756_v16  ;;  %v2033_v16 = vld [vmem:[%s3424_s24] sm:$0x1] (!%p2419_p1) }
 0x836   : > { %v1758_v9 = vadd.f32 1e-12, %v1757_v8 }
 0x838   : > { %2705 = vrsqrt.f32 %v1758_v9 }
 0x842   : > { %v2706_v10 = vpop.eup %2705 }
 0x843   : > { %v1760_v12 = vmul.f32 %v2706_v10, %v1752_v3 }
 0x845   : > { %v1767_v14 = vmul.f32 %v2405_v11, %v1760_v12 }
 0x847   : > { %v1774_v15 = vadd.f32 %v2406_v13, %v1767_v14 }
 0x849   : > { %v1775_v17 = vpack.c.bf16 %v1774_v15, %v1774_v15 }
 0x84b   : > { %2553 = vmatmul.mubr.msk.bf16.vlgmr.msra.gmra.mrb[28].mxu1 %vm1056_vm1, %v1775_v17 }
 0x84c   : > { %2580 = vmatprep.mubr.msk.bf16.mxu1 (!%p2419_p1), %vm2817_vm6, %v2816_v57  ;;  %2577 = vmatpush3.bf16.msra.mxu1 (!%p2419_p1), %v2713_v60 }
 0x84d   : > { %2578 = vmatprep.subr.bf16.mxu1 (!%p2419_p1), %v2816_v57 }
 0x850   : > { %2579 = vmatpush3.bf16.msra.mxu1 (!%p2419_p1), %v2714_v61 }
 0x91e   : > { %v1836_v23 = vpop.f32.mrb[28].mxu1 }
 0x91f   : > { %v1837_v24 = vadd.f32 %v2407_v22, %v1836_v23  ;;  %v2554_v25 = vpop.f32.mrb[29].mxu1 }
 0x920   : > { %v1839_v26 = vpop.f32.mrb[30].mxu1 }
 0x921   : > { %v1843_v27 = vmul.f32 0.70710677, %v1837_v24  ;;  %v2555_v28 = vpop.f32.mrb[31].mxu1  ;;  %v1842_v30 = vmul.f32 0.5, %v1837_v24 }
 0x923   : > { %2707 = verf.f32 %v1843_v27 }
 0x92d   : > { %v2708_v29 = vpop.eup %2707 }
 0x92e   : > { %v1845_v31 = vadd.f32 1.0, %v2708_v29 }
 0x930   : > { %v1846_v33 = vmul.f32 %v1845_v31, %v1842_v30 }
 0x932   : > { %v1847_v32 = vpack.c.bf16 %v1846_v33, %v1846_v33 }
 0x934   : > { %2565 = vmatmul.mubr.msk.bf16.vlgmr.msra.gmra.mrb[20].mxu0 %vm1887_vm5, %v1847_v32 }
 0x935   : > { %2569 = vmatpush3.bf16.msra.mxu0 (!%p2419_p1), %v2711_v56  ;;  %2572 = vmatprep.mubr.msk.bf16.mxu0 (!%p2419_p1), %vm2817_vm6, %v2816_v57 }
 0x936   : > { %2570 = vmatprep.subr.bf16.mxu0 (!%p2419_p1), %v2816_v57 }
 0x939   : > { %2571 = vmatpush3.bf16.msra.mxu0 (!%p2419_p1), %v2712_v58 }
 0x93a   : > { %2584 = vmatprep.subr.bf16.mxu0 (!%p2419_p1), %v2816_v57 }
 0xa07   : > { %v1925_v35 = vpop.f32.mrb[20].mxu0 }
 0xa08   : > { %v1926_v36 = vadd.f32 %v2411_v34, %v1925_v35  ;;  %v2566_v37 = vpop.f32.mrb[21].mxu0 }
 0xa09   : > { %v1928_v38 = vpop.f32.mrb[22].mxu0 }
 0xa0a   : > { %v2567_v39 = vpop.f32.mrb[23].mxu0  ;;  %v1931_v40 = vadd.f32 %v1926_v36, %v1774_v15  ;;  %v2095_v15 = vld [vmem:[%s3425_s16] sm:$0x1] (!%p2419_p1) }
 0xa0c   : > { %v1934_v41 = vsel %vm1056_vm1, %v1931_v40, 0.0 }
 0xa0d   : > { %1935 = vadd.xlane.f32.xlu1 %v1934_v41 }
 0xa9a   : > { %v1936_v42 = vpop.xlane.xlu1 %1935 }
 0xa9b   : > { %v1937_v43 = vmul.f32 0.03125, %v1936_v42 }
 0xa9d   : > { %v1938_v44 = vsub.f32 %v1931_v40, %v1937_v43 }
 0xa9f   : > { %v1939_v45 = vmul.f32 %v1938_v44, %v1938_v44 }
 0xaa1   : > { %v1940_v46 = vsel %vm1056_vm1, %v1939_v45, 0.0 }
 0xaa2   : > { %1941 = vadd.xlane.f32.xlu1 %v1940_v46 }
 0xb2f   : > { %v1942_v47 = vpop.xlane.xlu1 %1941 }
 0xb30   : > { %v1943_v48 = vmul.f32 0.03125, %v1942_v47 }
 0xb32   : > { %v1944_v49 = vadd.f32 1e-12, %v1943_v48 }
 0xb34   : > { %2709 = vrsqrt.f32 %v1944_v49 }
 0xb3e   : > { %v2710_v50 = vpop.eup %2709 }
 0xb3f   : > { %v1946_v52 = vmul.f32 %v2710_v50, %v1938_v44  ;;  %1965 = sbr.rel (%p2419_p1) target bundleno = 3538 (0xdd2), region = 116 }
 0xb41   : > { %v1953_v54 = vmul.f32 %v2417_v51, %v1946_v52 }
 0xb43   : > { %v1960_v55 = vadd.f32 %v2418_v53, %v1953_v54 }
 0xb45   : > { %1961 = vst.msk [vmem:[#allocation2] sm:$0xff] %vm1056_vm1, %v1960_v55  ;;  %v1966_v59 = vpack.c.bf16 (!%p2419_p1), %v1960_v55, %v1960_v55 }
 0xb47   : > { %2573 = vmatmul.mubr.msk.bf16.vlgmr.msra.gmra.mrb[0].mxu0 %vm1056_vm1, %v1966_v59 }
 0xb48   : > { %2588 = vmatprep.mubr.msk.bf16.mxu0 %vm2817_vm6, %v2816_v57  ;;  %2585 = vmatpush3.bf16.msra.mxu0 %v2715_v62 }
 0xb49   : > { %2586 = vmatprep.subr.bf16.mxu0 %v2816_v57 }
 0xb4c   : > { %2587 = vmatpush3.bf16.msra.mxu0 %v2716_v7 }
 0xc1a   : > { %v2021_v0 = vpop.f32.mrb[0].mxu0 }
 0xc1b   : > { %v2022_v1 = vadd.f32 %v2021_v0, %v1971_v63  ;;  %v2574_v2 = vpop.f32.mrb[1].mxu0 }
 0xc1c   : > { %v2024_v3 = vpop.f32.mrb[2].mxu0 }
 0xc1d   : > { %v2027_v4 = vmax.f32 %v2022_v1, 0.0  ;;  %v2575_v5 = vpop.f32.mrb[3].mxu0 }
 0xc1f   : > { %v2028_v6 = vpack.c.bf16 %v2027_v4, %v2027_v4 }
 0xc21   : > { %2581 = vmatmul.mubr.msk.bf16.vlgmr.msra.gmra.mrb[0].mxu1 %vm1056_vm1, %v2028_v6 }
 0xcf4   : > { %v2083_v8 = vpop.f32.mrb[0].mxu1 }
 0xcf5   : > { %v2084_v9 = vadd.f32 %v2083_v8, %v2033_v16  ;;  %v2582_v10 = vpop.f32.mrb[1].mxu1 }
 0xcf6   : > { %v2086_v11 = vpop.f32.mrb[2].mxu1 }
 0xcf7   : > { %v2089_v12 = vmax.f32 %v2084_v9, 0.0  ;;  %v2583_v13 = vpop.f32.mrb[3].mxu1 }
 0xcf9   : > { %v2090_v14 = vpack.c.bf16 %v2089_v12, %v2089_v12 }
 0xcfb   : > { %2589 = vmatmul.mubr.msk.bf16.vlgmr.msra.gmra.mrb[4].mxu0 %vm1056_vm1, %v2090_v14 }
 0xdce   : > { %v2145_v17 = vpop.f32.mrb[4].mxu0 }
 0xdcf   : > { %v2146_v18 = vadd.f32 %v2145_v17, %v2095_v15  ;;  %v2590_v19 = vpop.f32.mrb[5].mxu0 }
 0xdd0   : > { %v2148_v20 = vpop.f32.mrb[6].mxu0 }
 0xdd1   : > { %2151 = vst [vmem:[%s3079_s26] sm:$0x1] %v2146_v18  ;;  %v2591_v21 = vpop.f32.mrb[7].mxu0 }
 0xdd2 PF: > { %s3426_s25 = sld [smem:[#allocation9_spill]]  ;;  %s3428_s30 = sld [smem:[#allocation34_spill]] }
 0xdd3   : > { %s2165_s3 = sshll.u32 %s3079_s26, 4  ;;  %s3430_s20 = sand.u32 1, %s2787_s28   ;;  %s2166_s3 = int_to_ptr.vmem [resolvable:$true] %s2165_s3 }
 0xdd4   : > { %s2153_s23 = scalar_lea.sflag [#allocation4], %s3430_s20  ;;  %s2717_s15 = scalar_lea.vmem %s2166_s3, 16 }
 0xdd5   : > { %p2718_p2 = scmp.ne.s32.totalorder %s2166_s3, %s2717_s15  ;;  %s2818_s0 = smov [#allocation3]  }
 0xdd6   : > { %s2721_s17 = sshll.u32 %s2818_s0, 4  ;;  %s2722_s17 = int_to_ptr.vmem [resolvable:$false] %s2721_s17 }
 0xdd7   : > { %p2719_p4 = pnand %p2718_p2, %p2983_p3  ;;  %s2723_s21 = scalar_lea.vmem %s2722_s17, 32 }
 0xdd8   : > { %s2429_s2 = sshll.u32 %s3426_s25, 4  ;;  %s3429_s19 = smov %s3428_s30 }
 0xdd9   : > { %s3278_s1 = scalar_lea.hbm %s3428_s30, %s2429_s2  ;;  %p2720_p5 = pneg %p2719_p4 }
 0xdda   : > { %p2724_p6 = scmp.lt.s32.totalorder %s2166_s3, %s2722_s17  ;;  %p2725_p7 = scmp.lt.s32.totalorder %s2723_s21, %s2717_s15 }
 0xddc   : > { %p2726_p8 = por %p2725_p7, %p2724_p6 }
 0xdde   : > { %p2727_p10 = pnand %p2726_p8, %p2720_p5 }
 0xde0   : > { %2730 = shalt.err (!%p2727_p10)
}
 0xde1   : > { %s2731_s26 = scalar_lea.hbm %s3278_s1, 16  ;;  %s2735_s4 = scalar_lea.hbm %s3429_s19, 32 }
 0xde2   : > { %p2732_p11 = scmp.ne.s32.totalorder %s3278_s1, %s2731_s26  ;;  %p2736_p0 = scmp.lt.u32.totalorder %s3278_s1, %s3429_s19 }
 0xde3   : > { %p2737_p1 = scmp.lt.u32.totalorder %s2735_s4, %s2731_s26  ;;  %p2739_p4 = scmp.lt.u32.totalorder %s2731_s26, %s3278_s1 }
 0xde4   : > { %p2733_p12 = pnand %p2732_p11, %p2983_p3 }
 0xde5   : > { %p2738_p2 = por %p2737_p1, %p2736_p0 }
 0xde6   : > { %p2734_p13 = pneg %p2733_p12 }
 0xde7   : > { %p2740_p5 = por %p2739_p4, %p2738_p2 }
 0xde9   : > { %p2741_p6 = pnand %p2740_p5, %p2734_p13 }
 0xdeb   : > { %2744 = shalt.err (!%p2741_p6)
}
 0xdec   : > { %2595 = dma.vmem_to_hbm [thread:$0]  (%p2983_p3), %s2166_s3, 16, %s3278_s1, %s2153_s23  }
 0xded PF: > { %s3431_s2 = sld [smem:[#allocation12_spill]]  ;;  %s3432_s5 = sld [smem:[#allocation6_spill]] }
 0xdf3   : > { %p2601_p7 = scmp.ge.s32.totalorder %s3431_s2, 2  ;;  %s2177_s30 = sand.u32 1, %s3432_s5  }
 0xdf4   : > { %s2178_s20 = scalar_lea.sflag [#allocation4], %s2177_s30 }
 0xdf5   : > { %p2598_p8 = pnand %p2601_p7, %p2993_p9 }
 0xdf7   : > { %2778 = dma.done.wait (!%p2598_p8), %s2178_s20, 16  }
 0xdf8   : > { %2780 = vsyncadd (!%p2598_p8), %s2178_s20, 4294967280  ;;  %s35_s1 = sadd.s32 1, %s3431_s2   ;;  %s3434_s15 = sld [smem:[#allocation7_spill]] }
 0xdf9   : > { %p32_p10 = scmp.ge.s32.totalorder %s35_s1, 6   ;;  %s3435_s29 = sld [smem:[#allocation17_spill]] }
 0xdfa   : > { %s3436_s30 = sld [smem:[#allocation10_spill]]  ;;  %s3437_s4 = sld [smem:[#allocation11_spill]] }
 0xdfb   : > { %s3438_s0 = sld [smem:[#allocation13_spill]]  ;;  %s3439_s23 = sld [smem:[#allocation15_spill]] }
 0xdfc   : > { %s3440_s3 = smov %s2787_s28  ;;  %34 = sbr.rel (!%p32_p10) target bundleno = 22 (0x16), region = 190 }
 0xdfe   : > { %s3441_s28 = smov %s3434_s15 }
 0xe03   :  { %2182 = vsyncpa [#allocation4], 1 }
 0xe04   :  { %2184 = vsyncpa [#allocation4 + $0x1], 1 }

</bundles_post_ra>
